<compile_context>
chip_gen: v5e
topology: v5e:2x2
jax: 0.10.0
libtpu: 0.0.40
codegen_flags: <defaults>
</compile_context>

<pallas_src>
import numpy as np
import jax
import jax.numpy as jnp
from jax.experimental import pallas as pl
from jax.experimental.pallas import tpu as pltpu


# ----------------------------------------------------------------------------
# Reference build_image (verbatim numpy port of the PyTorch reference)
# ----------------------------------------------------------------------------
def build_image(voxels, clust, values=None, size=32):
    image = []
    mins = np.min(voxels, axis=0)
    ranges = np.ptp(voxels, axis=0)
    max_range = np.max(ranges) + 1
    grid_step = 1.0 / max_range
    grid_mins = (voxels - mins - ranges / 2 - 0.5) * grid_step + 0.5
    new_step = 1.0 / size
    for e, v in enumerate(grid_mins):
        imins = (v / new_step).astype(int)
        imaxs = ((v - 1e-09 + grid_step) / new_step).astype(int) + 1
        for i in range(imins[0], imaxs[0]):
            for j in range(imins[1], imaxs[1]):
                for k in range(imins[2], imaxs[2]):
                    idx = np.array([i, j, k])
                    fracs = (np.min([v + grid_step, (idx + 1) * new_step], axis=0)
                             - np.max([v, idx * new_step], axis=0)) / grid_step
                    image.append([i, j, k, len(voxels), np.prod(fracs) * values[e]])
    return (np.array(image), float(size) / max_range, mins + ranges / 2)


# ----------------------------------------------------------------------------
# Synthetic encoder sizes (EncoderLayer substitute)
# ----------------------------------------------------------------------------
C1, C2, FEAT = 8, 16, 32   # conv1 / conv2 channels, output feature size
K3 = 27                    # 3x3x3 kernel taps


# ----------------------------------------------------------------------------
# Pallas kernels
# ----------------------------------------------------------------------------
def _conv1_kernel(col_ref, w_ref, b_ref, o_ref):
    # Lane-dense conv1 GEMM: (C1, 27) @ (27, TN) -> (C1, TN).  bf16 operands, f32 acc.
    acc = jnp.dot(w_ref[...], col_ref[...], preferred_element_type=jnp.float32)
    o_ref[...] = jnp.maximum(acc + b_ref[...], 0.0).astype(o_ref.dtype)


def _tail_kernel(col2_ref, w2t_ref, b2_ref, poolT_ref, wf_ref, bf_ref, o_ref):
    # Fused conv2 + ReLU + global mean pool + final linear.  All intermediates stay in VMEM.
    # conv2: (EPB*V2, C1*27) @ (C1*27, C2) -- bf16 operands, f32 accumulation.
    y2 = jnp.dot(col2_ref[...], w2t_ref[...], preferred_element_type=jnp.float32)
    y2 = jnp.maximum(y2 + b2_ref[...], 0.0)                                   # (EPB*V2, C2)
    # global mean pool as matmul with the constant block-diagonal (1/V2) matrix
    pooled = jnp.dot(poolT_ref[...], y2, preferred_element_type=jnp.float32)  # (EPB, C2)
    # final linear fused in the epilogue (no extra launch / HBM roundtrip)
    feats = jnp.dot(pooled, wf_ref[...], preferred_element_type=jnp.float32) + bf_ref[...]
    o_ref[...] = feats.astype(o_ref.dtype)                                    # (EPB, FEAT)


def conv1_gemm(col1, w1_mat, b1, v1, edges_per_step=4):
    """col1: (27, E*V1); w1_mat: (C1, 27); b1: (C1,).  Returns y1 (C1, E*V1) f32."""
    K, N = col1.shape
    cout = w1_mat.shape[0]
    tn = min(edges_per_step, max(1, N // v1)) * v1
    if tn % 128 != 0:
        tn = N                      # fall back to a single full-extent lane block
    grid = (pl.cdiv(N, tn),)        # ragged last block handled by masked stores
    return pl.pallas_call(
        _conv1_kernel,
        out_shape=jax.ShapeDtypeStruct((cout, N), jnp.float32),
        grid=grid,
        in_specs=[
            pl.BlockSpec((K, tn), lambda i: (0, i)),
            pl.BlockSpec((cout, K), lambda i: (0, 0)),
            pl.BlockSpec((cout, 1), lambda i: (0, 0)),
        ],
        out_specs=pl.BlockSpec((cout, tn), lambda i: (0, i)),
        compiler_params=pltpu.CompilerParams(dimension_semantics=("parallel",)),
    )(col1.astype(jnp.bfloat16),
      w1_mat.astype(jnp.bfloat16),
      b1.reshape(cout, 1).astype(jnp.float32))


def conv2_pool_linear(col2, w2t_mat, b2, wf, bf, v2, edges_per_block):
    """col2: (Epad*V2, C1*27) with Epad a multiple of edges_per_block.
    Returns feats (Epad, FEAT) f32."""
    ntot, k2 = col2.shape
    epad = ntot // v2
    epb = edges_per_block
    c2 = w2t_mat.shape[1]
    feat = wf.shape[1]
    # block-diagonal mean-pool matrix: poolT[e, e*V2 + s] = 1/V2
    poolT = (jnp.kron(jnp.eye(epb, dtype=jnp.float32),
                      jnp.ones((1, v2), jnp.float32)) / float(v2))
    grid = (epad // epb,)
    return pl.pallas_call(
        _tail_kernel,
        out_shape=jax.ShapeDtypeStruct((epad, feat), jnp.float32),
        grid=grid,
        in_specs=[
            pl.BlockSpec((epb * v2, k2), lambda i: (i, 0)),
            pl.BlockSpec((k2, c2), lambda i: (0, 0)),
            pl.BlockSpec((1, c2), lambda i: (0, 0)),
            pl.BlockSpec((epb, epb * v2), lambda i: (0, 0)),
            pl.BlockSpec((c2, feat), lambda i: (0, 0)),
            pl.BlockSpec((1, feat), lambda i: (0, 0)),
        ],
        out_specs=pl.BlockSpec((epb, feat), lambda i: (i, 0)),
        compiler_params=pltpu.CompilerParams(dimension_semantics=("parallel",)),
    )(col2.astype(jnp.bfloat16),
      w2t_mat.astype(jnp.bfloat16),
      b2.reshape(1, c2).astype(jnp.float32),
      poolT,
      wf.astype(jnp.float32),
      bf.reshape(1, feat).astype(jnp.float32))


# ----------------------------------------------------------------------------
# im2col glue (XLA)
# ----------------------------------------------------------------------------
def _im2col_3d(x, ksize=3, stride=2, pad=1):
    """x: (E, C, D, H, W) -> (col (E, C*k^3, Do*Ho*Wo), (Do, Ho, Wo)).
    K index ordered (c, kd, kh, kw), matching torch Conv3d weight.reshape(Cout, -1)."""
    E, C, D, H, W = x.shape
    xp = jnp.pad(x, ((0, 0), (0, 0), (pad, pad), (pad, pad), (pad, pad)))
    Do = (D + 2 * pad - ksize) // stride + 1
    Ho = (H + 2 * pad - ksize) // stride + 1
    Wo = (W + 2 * pad - ksize) // stride + 1
    cols = []
    for kd in range(ksize):
        for kh in range(ksize):
            for kw in range(ksize):
                cols.append(xp[:, :,
                               kd:kd + Do * stride:stride,
                               kh:kh + Ho * stride:stride,
                               kw:kw + Wo * stride:stride])
    col = jnp.stack(cols, axis=2)                        # (E, C, k^3, Do, Ho, Wo)
    col = col.reshape(E, C * ksize ** 3, Do * Ho * Wo)
    return col, (Do, Ho, Wo)


# ----------------------------------------------------------------------------
# Synthetic encoder (replaces undefined EncoderLayer) - two pallas_calls total
# ----------------------------------------------------------------------------
def init_encoder_params(key):
    k1, k2, k3, k4, k5, k6 = jax.random.split(key, 6)
    w1 = jax.random.normal(k1, (C1, 1, 3, 3, 3), jnp.float32) * 0.1   # torch Conv3d layout
    b1 = jax.random.normal(k2, (C1,), jnp.float32) * 0.01
    w2 = jax.random.normal(k3, (C2, C1, 3, 3, 3), jnp.float32) * 0.1
    b2 = jax.random.normal(k4, (C2,), jnp.float32) * 0.01
    wf = jax.random.normal(k5, (C2, FEAT), jnp.float32) * 0.1
    bf = jax.random.normal(k6, (FEAT,), jnp.float32) * 0.01
    return {
        "w1_mat": w1.reshape(C1, K3),          # (C1, 27)    lane-dense conv1 LHS
        "b1": b1,
        "w2t_mat": w2.reshape(C2, C1 * K3).T,  # (C1*27, C2) fused conv2 GEMM RHS
        "b2": b2,
        "wf": wf,                              # (C2, FEAT)
        "bf": bf,
    }


@jax.jit
def encoder_forward(dense, params):
    """dense: (E, 1, S, S, S) per-edge images -> (E, FEAT) features."""
    E = dense.shape[0]
    # ---- conv1 + ReLU: lane-dense GEMM (C1, 27) @ (27, E*V1) -------------------
    col1, o1 = _im2col_3d(dense, 3, 2, 1)                    # (E, 27, V1)
    V1 = o1[0] * o1[1] * o1[2]
    col1 = col1.transpose(1, 0, 2).reshape(K3, E * V1)       # spatial on lanes
    y1 = conv1_gemm(col1, params["w1_mat"], params["b1"], V1)  # (C1, E*V1) f32
    # ---- im2col for conv2 (XLA glue) -------------------------------------------
    # TODO(synk): a single fully fused kernel would need in-kernel im2col of the
    # VMEM-resident y1; kept as wrapper glue for robust lowering.
    y1 = y1.reshape(C1, E, *o1).transpose(1, 0, 2, 3, 4)     # (E, C1, S1, S1, S1)
    col2, o2 = _im2col_3d(y1, 3, 2, 1)                       # (E, C1*27, V2)
    V2 = o2[0] * o2[1] * o2[2]
    col2 = col2.transpose(0, 2, 1).reshape(E * V2, C1 * K3)  # rows = (edge, spatial)
    # ---- pad the edge count so every grid step owns whole edges ----------------
    epb = 8 if (8 * V2) % 128 == 0 else max(1, E)
    epad = ((E + epb - 1) // epb) * epb
    if epad != E:
        col2 = jnp.pad(col2, ((0, (epad - E) * V2), (0, 0)))
    # ---- fused conv2 + ReLU + global mean pool + final linear ------------------
    feats = conv2_pool_linear(col2, params["w2t_mat"], params["b2"],
                              params["wf"], params["bf"], V2, edges_per_block=epb)
    return feats[:E]


# ----------------------------------------------------------------------------
# ClustCNNEdgeEncoder.forward
# ----------------------------------------------------------------------------
def clust_cnn_edge_encoder_forward(data, clusts, edge_index, params, size=16):
    """data: (Nvox, >=5) numpy [x, y, z, batch, value]; clusts: list of index arrays;
    edge_index: (2, E) numpy int."""
    half_idx = int(edge_index.shape[1] / 2)
    undirected = (not edge_index.shape[1] % 2) and \
        [edge_index[1, 0], edge_index[0, 0]] == edge_index[:, half_idx].tolist()
    if undirected:
        edge_index = edge_index[:, :half_idx]

    # Build the sparse (i, j, k, edge_id, value) table, as in the reference forward.
    # Note: the reference only overwrites the last len(ci)+len(cj) rows' batch column
    # (upstream quirk); we tag every row of the edge's block with the edge id, which is
    # the intended grouping consumed by the encoder.
    blocks = []
    for i, e in enumerate(edge_index.T):
        ci, cj = clusts[e[0]], clusts[e[1]]
        aux_i = build_image(data[ci, :3], i, values=data[ci, 4], size=size)[0]
        aux_j = build_image(data[cj, :3], i, values=data[cj, 4], size=size)[0]
        aux = np.concatenate([aux_i, aux_j], axis=0).astype(np.float32)
        aux[:, 3] = float(i)
        blocks.append(aux)
    cnn_data = np.concatenate(blocks, axis=0)

    # Densify the sparse voxel table into per-edge NCDHW images (scatter-add of values).
    # build_image can emit indices == size for voxels whose extent touches the upper grid
    # boundary; clip so boundary spill folds into the edge voxel (fixes the OOB scatter).
    E = edge_index.shape[1]
    dense = np.zeros((E, 1, size, size, size), np.float32)
    ii = np.clip(cnn_data[:, 0].astype(int), 0, size - 1)
    jj = np.clip(cnn_data[:, 1].astype(int), 0, size - 1)
    kk = np.clip(cnn_data[:, 2].astype(int), 0, size - 1)
    bb = cnn_data[:, 3].astype(int)
    np.add.at(dense, (bb, np.zeros_like(bb), ii, jj, kk), cnn_data[:, 4])

    feats = encoder_forward(jnp.asarray(dense), params)
    if undirected:
        feats = jnp.concatenate([feats, feats], axis=0)
    return feats


# ----------------------------------------------------------------------------
# Demo
# ----------------------------------------------------------------------------
if __name__ == "__main__":
    key = jax.random.PRNGKey(0)
    kc, kv, kp = jax.random.split(key, 3)

    # 30 voxels, 3 clusters of 10; data columns: x, y, z, batch, value
    coords = jax.random.uniform(kc, (30, 3), jnp.float32, 0.0, 10.0)
    values = jax.random.uniform(kv, (30,), jnp.float32, 0.5, 1.5)
    data = np.asarray(jnp.concatenate(
        [coords, jnp.zeros((30, 1), jnp.float32), values[:, None]], axis=1))

    clusts = [np.arange(0, 10), np.arange(10, 20), np.arange(20, 30)]
    # undirected edge list: (0,1), (0,2) and their reverses
    edge_index = np.array([[0, 0, 1, 2],
                           [1, 2, 0, 0]], dtype=np.int64)

    params = init_encoder_params(kp)
    feats = clust_cnn_edge_encoder_forward(data, clusts, edge_index, params, size=16)
    feats = jax.block_until_ready(feats)
    assert feats.shape == (4, FEAT) and feats.dtype == jnp.float32
    assert bool(jnp.all(jnp.isfinite(feats)))
    print("KERNEL_OK")
</pallas_src>

<mosaic_0001>
module attributes {stable_mosaic.version = 11 : i64} {
  func.func @_conv1_kernel(%arg0: i32, %arg1: memref<27x1024xbf16, #tpu.memory_space<vmem>>, %arg2: memref<8x27xbf16, #tpu.memory_space<vmem>>, %arg3: memref<8x1xf32, #tpu.memory_space<vmem>>, %arg4: memref<8x1024xf32, #tpu.memory_space<vmem>>) attributes {dimension_semantics = [#tpu.dimension_semantics<parallel>], iteration_bounds = array<i64: 1>, scalar_prefetch = 0 : i64, scratch_operands = 0 : i64, tpu.core_type = #tpu.core_type<tc>, window_params = [{transform_indices = @transform_0, window_bounds = array<i64: 27, 1024>}, {pipeline_mode = #tpu.pipeline_mode<synchronous>, transform_indices = @transform_1, window_bounds = array<i64: 8, 27>}, {pipeline_mode = #tpu.pipeline_mode<synchronous>, transform_indices = @transform_2, window_bounds = array<i64: 8, 1>}, {transform_indices = @transform_3, window_bounds = array<i64: 8, 1024>}]} {
    %c0 = arith.constant 0 : index
    %c0_0 = arith.constant 0 : index
    %0 = vector.load %arg2[%c0, %c0_0] : memref<8x27xbf16, #tpu.memory_space<vmem>>, vector<8x27xbf16>
    %c0_1 = arith.constant 0 : index
    %c0_2 = arith.constant 0 : index
    %1 = vector.load %arg1[%c0_1, %c0_2] : memref<27x1024xbf16, #tpu.memory_space<vmem>>, vector<27x1024xbf16>
    %cst = arith.constant dense<0.000000e+00> : vector<8x1024xf32>
    %2 = tpu.matmul %0, %1, %cst {dimension_numbers = #tpu.dot_dimension_numbers<[1], [0], [0], [1], [0, 0, 1, 1], [], []>} : vector<8x27xbf16>, vector<27x1024xbf16>, vector<8x1024xf32> -> vector<8x1024xf32>
    %c0_3 = arith.constant 0 : index
    %c0_4 = arith.constant 0 : index
    %3 = vector.load %arg3[%c0_3, %c0_4] : memref<8x1xf32, #tpu.memory_space<vmem>>, vector<8x1xf32>
    %4 = vector.broadcast %3 : vector<8x1xf32> to vector<8x1024xf32>
    %5 = arith.addf %2, %4 : vector<8x1024xf32>
    %cst_5 = arith.constant 0.000000e+00 : f32
    %6 = vector.broadcast %cst_5 : f32 to vector<8x1024xf32>
    %7 = arith.maximumf %5, %6 : vector<8x1024xf32>
    %c0_6 = arith.constant 0 : index
    %c0_7 = arith.constant 0 : index
    %8 = vector.load %arg4[%c0_6, %c0_7] : memref<8x1024xf32, #tpu.memory_space<vmem>>, vector<8x1024xf32>
    tpu.vector_store %arg4[%c0_6, %c0_7], %7 {strides = array<i32>} : memref<8x1024xf32, #tpu.memory_space<vmem>>, vector<8x1024xf32>,
    return
  }
  func.func @transform_0(%arg0: i32) -> (i32, i32) {
    %c0_i32 = arith.constant 0 : i32
    %c0_i32_0 = arith.constant 0 : i32
    return %c0_i32, %arg0 : i32, i32
  }
  func.func @transform_1(%arg0: i32) -> (i32, i32) {
    %c0_i32 = arith.constant 0 : i32
    %c0_i32_0 = arith.constant 0 : i32
    %c0_i32_1 = arith.constant 0 : i32
    return %c0_i32, %c0_i32_0 : i32, i32
  }
  func.func @transform_2(%arg0: i32) -> (i32, i32) {
    %c0_i32 = arith.constant 0 : i32
    %c0_i32_0 = arith.constant 0 : i32
    %c0_i32_1 = arith.constant 0 : i32
    return %c0_i32, %c0_i32_0 : i32, i32
  }
  func.func @transform_3(%arg0: i32) -> (i32, i32) {
    %c0_i32 = arith.constant 0 : i32
    %c0_i32_0 = arith.constant 0 : i32
    return %c0_i32, %arg0 : i32, i32
  }
}

module attributes {stable_mosaic.version = 11 : i64} {
  func.func @_tail_kernel(%arg0: i32, %arg1: memref<512x216xbf16, #tpu.memory_space<vmem>>, %arg2: memref<216x16xbf16, #tpu.memory_space<vmem>>, %arg3: memref<1x16xf32, #tpu.memory_space<vmem>>, %arg4: memref<8x512xf32, #tpu.memory_space<vmem>>, %arg5: memref<16x32xf32, #tpu.memory_space<vmem>>, %arg6: memref<1x32xf32, #tpu.memory_space<vmem>>, %arg7: memref<8x32xf32, #tpu.memory_space<vmem>>) attributes {dimension_semantics = [#tpu.dimension_semantics<parallel>], iteration_bounds = array<i64: 1>, scalar_prefetch = 0 : i64, scratch_operands = 0 : i64, tpu.core_type = #tpu.core_type<tc>, window_params = [{transform_indices = @transform_0, window_bounds = array<i64: 512, 216>}, {pipeline_mode = #tpu.pipeline_mode<synchronous>, transform_indices = @transform_1, window_bounds = array<i64: 216, 16>}, {pipeline_mode = #tpu.pipeline_mode<synchronous>, transform_indices = @transform_2, window_bounds = array<i64: 1, 16>}, {pipeline_mode = #tpu.pipeline_mode<synchronous>, transform_indices = @transform_3, window_bounds = array<i64: 8, 512>}, {pipeline_mode = #tpu.pipeline_mode<synchronous>, transform_indices = @transform_4, window_bounds = array<i64: 16, 32>}, {pipeline_mode = #tpu.pipeline_mode<synchronous>, transform_indices = @transform_5, window_bounds = array<i64: 1, 32>}, {transform_indices = @transform_6, window_bounds = array<i64: 8, 32>}]} {
    %c0 = arith.constant 0 : index
    %c0_0 = arith.constant 0 : index
    %0 = vector.load %arg1[%c0, %c0_0] : memref<512x216xbf16, #tpu.memory_space<vmem>>, vector<512x216xbf16>
    %c0_1 = arith.constant 0 : index
    %c0_2 = arith.constant 0 : index
    %1 = vector.load %arg2[%c0_1, %c0_2] : memref<216x16xbf16, #tpu.memory_space<vmem>>, vector<216x16xbf16>
    %cst = arith.constant dense<0.000000e+00> : vector<512x16xf32>
    %2 = tpu.matmul %0, %1, %cst {dimension_numbers = #tpu.dot_dimension_numbers<[1], [0], [0], [1], [0, 0, 1, 1], [], []>} : vector<512x216xbf16>, vector<216x16xbf16>, vector<512x16xf32> -> vector<512x16xf32>
    %c0_3 = arith.constant 0 : index
    %c0_4 = arith.constant 0 : index
    %3 = vector.load %arg3[%c0_3, %c0_4] : memref<1x16xf32, #tpu.memory_space<vmem>>, vector<1x16xf32>
    %4 = vector.broadcast %3 : vector<1x16xf32> to vector<512x16xf32>
    %5 = arith.addf %2, %4 : vector<512x16xf32>
    %cst_5 = arith.constant 0.000000e+00 : f32
    %6 = vector.broadcast %cst_5 : f32 to vector<512x16xf32>
    %7 = arith.maximumf %5, %6 : vector<512x16xf32>
    %c0_6 = arith.constant 0 : index
    %c0_7 = arith.constant 0 : index
    %8 = vector.load %arg4[%c0_6, %c0_7] : memref<8x512xf32, #tpu.memory_space<vmem>>, vector<8x512xf32>
    %cst_8 = arith.constant dense<0.000000e+00> : vector<8x16xf32>
    %9 = tpu.matmul %8, %7, %cst_8 {dimension_numbers = #tpu.dot_dimension_numbers<[1], [0], [0], [1], [0, 0, 1, 1], [], []>} : vector<8x512xf32>, vector<512x16xf32>, vector<8x16xf32> -> vector<8x16xf32>
    %c0_9 = arith.constant 0 : index
    %c0_10 = arith.constant 0 : index
    %10 = vector.load %arg5[%c0_9, %c0_10] : memref<16x32xf32, #tpu.memory_space<vmem>>, vector<16x32xf32>
    %cst_11 = arith.constant dense<0.000000e+00> : vector<8x32xf32>
    %11 = tpu.matmul %9, %10, %cst_11 {dimension_numbers = #tpu.dot_dimension_numbers<[1], [0], [0], [1], [0, 0, 1, 1], [], []>} : vector<8x16xf32>, vector<16x32xf32>, vector<8x32xf32> -> vector<8x32xf32>
    %c0_12 = arith.constant 0 : index
    %c0_13 = arith.constant 0 : index
    %12 = vector.load %arg6[%c0_12, %c0_13] : memref<1x32xf32, #tpu.memory_space<vmem>>, vector<1x32xf32>
    %13 = vector.broadcast %12 : vector<1x32xf32> to vector<8x32xf32>
    %14 = arith.addf %11, %13 : vector<8x32xf32>
    %c0_14 = arith.constant 0 : index
    %c0_15 = arith.constant 0 : index
    %15 = vector.load %arg7[%c0_14, %c0_15] : memref<8x32xf32, #tpu.memory_space<vmem>>, vector<8x32xf32>
    tpu.vector_store %arg7[%c0_14, %c0_15], %14 {strides = array<i32>} : memref<8x32xf32, #tpu.memory_space<vmem>>, vector<8x32xf32>,
    return
  }
  func.func @transform_0(%arg0: i32) -> (i32, i32) {
    %c0_i32 = arith.constant 0 : i32
    %c0_i32_0 = arith.constant 0 : i32
    return %arg0, %c0_i32 : i32, i32
  }
  func.func @transform_1(%arg0: i32) -> (i32, i32) {
    %c0_i32 = arith.constant 0 : i32
    %c0_i32_0 = arith.constant 0 : i32
    %c0_i32_1 = arith.constant 0 : i32
    return %c0_i32, %c0_i32_0 : i32, i32
  }
  func.func @transform_2(%arg0: i32) -> (i32, i32) {
    %c0_i32 = arith.constant 0 : i32
    %c0_i32_0 = arith.constant 0 : i32
    %c0_i32_1 = arith.constant 0 : i32
    return %c0_i32, %c0_i32_0 : i32, i32
  }
  func.func @transform_3(%arg0: i32) -> (i32, i32) {
    %c0_i32 = arith.constant 0 : i32
    %c0_i32_0 = arith.constant 0 : i32
    %c0_i32_1 = arith.constant 0 : i32
    return %c0_i32, %c0_i32_0 : i32, i32
  }
  func.func @transform_4(%arg0: i32) -> (i32, i32) {
    %c0_i32 = arith.constant 0 : i32
    %c0_i32_0 = arith.constant 0 : i32
    %c0_i32_1 = arith.constant 0 : i32
    return %c0_i32, %c0_i32_0 : i32, i32
  }
  func.func @transform_5(%arg0: i32) -> (i32, i32) {
    %c0_i32 = arith.constant 0 : i32
    %c0_i32_0 = arith.constant 0 : i32
    %c0_i32_1 = arith.constant 0 : i32
    return %c0_i32, %c0_i32_0 : i32, i32
  }
  func.func @transform_6(%arg0: i32) -> (i32, i32) {
    %c0_i32 = arith.constant 0 : i32
    %c0_i32_0 = arith.constant 0 : i32
    return %arg0, %c0_i32 : i32, i32
  }
}

</mosaic_0001>

<bundles_post_ra>
// kernel: encoder_forward.2
= control target key start
LH: loop header
LB: loop body
LE: loop exit
PB: predicated region body
PF: predicated region fallthrough
CT: control target
= control target key end

     0   :  { %vm114_vm0 = vcmask 1044480   ;;  %vm115_vm1 = vcmask 1045504   ;;  %v357_v2 = vmov 65535   ;;  %v358_v8 = vmov 0   ;;  %s513_s0 = inlined_call_operand.vmem [shape: bf16[27,1024], index: 0, kind: input, shape index: {}]   ;;  %s514_s2 = inlined_call_operand.vmem [shape: f32[8,1], index: 2, kind: input, shape index: {}]   ;;  %s515_s1 = inlined_call_operand.vmem [shape: bf16[8,27], index: 1, kind: input, shape index: {}]   ;;  %s516_s3 = inlined_call_operand.vmem [shape: f32[8,1024], index: 3, kind: output, shape index: {}]  }
   0x1   :  { %v300_v0 = vld [vmem:[%s513_s0 + $0x40] sm:$0xf]  ;;  %v116_v3 = vsel %vm114_vm0, 4294967295, %v357_v2  ;;  %v346_v6 = vld [vmem:[%s513_s0 + $0x44] sm:$0xf]  ;;  %356 = vset.pattern.permute.xlu0 %v358_v8  ;;  %vm110_vm2 = vcmask 220160  }
   0x2   :  { %v350_v1 = vld [vmem:[%s513_s0 + $0x5c] sm:$0x30]  ;;  %v117_v5 = vsel %vm115_vm1, %v116_v3, 0  ;;  %v302_v7 = vld [vmem:[%s513_s0 + $0x60] sm:$0x30] }
   0x3   :  { %v301_v4 = vor.u32 %v350_v1, %v300_v0  ;;  %v32_v9 = vld [vmem:[%s514_s2] sm:$0xff]  ;;  %v305_v10 = vor.u32 %v346_v6, %v302_v7  ;;  %v308_v11 = vld [vmem:[%s513_s0 + $0x48] sm:$0xf]  ;;  %v347_v13 = vld [vmem:[%s513_s0 + $0x4c] sm:$0xf] }
   0x4   :  { %v351_v12 = vld [vmem:[%s513_s0 + $0x64] sm:$0x30]  ;;  %35 = vperm.xlu0 %356, %v32_v9   ;;  %v310_v16 = vld [vmem:[%s513_s0 + $0x68] sm:$0x30]  ;;  %v268_v17 = vld [vmem:[%s513_s0] sm:$0xf] }
   0x5   :  { %v119_v14 = vand.u32 %v301_v4, %v117_v5  ;;  %v309_v15 = vor.u32 %v351_v12, %v308_v11  ;;  %v342_v18 = vld [vmem:[%s513_s0 + $0x1c] sm:$0xf0]  ;;  %v122_v19 = vand.u32 %v305_v10, %v117_v5  ;;  %v313_v20 = vor.u32 %v347_v13, %v310_v16  ;;  %v338_v21 = vld [vmem:[%s513_s0 + $0x4] sm:$0xf]  ;;  %v276_v23 = vld [vmem:[%s513_s0 + $0x8] sm:$0xf] }
   0x6   :  { %v270_v22 = vld [vmem:[%s513_s0 + $0x20] sm:$0xf0]  ;;  %v269_v25 = vor.u32 %v342_v18, %v268_v17  ;;  %v343_v26 = vld [vmem:[%s513_s0 + $0x24] sm:$0xf0]  ;;  %v339_v27 = vld [vmem:[%s513_s0 + $0xc] sm:$0xf] }
   0x7   :  { %148 = vmatpush.bf16.msra.mxu0 %v119_v14  ;;  %v125_v24 = vand.u32 %v309_v15, %v117_v5  ;;  %v278_v28 = vld [vmem:[%s513_s0 + $0x28] sm:$0xf0]  ;;  %161 = vmatpush.bf16.msra.mxu1 %v122_v19  ;;  %v128_v29 = vand.u32 %v313_v20, %v117_v5  ;;  %v273_v30 = vor.u32 %v338_v21, %v270_v22  ;;  %v324_v31 = vld [vmem:[%s513_s0 + $0x58] sm:$0xf]  ;;  %v349_v35 = vld [vmem:[%s513_s0 + $0x5c] sm:$0xf] }
   0x8   :  { %v353_v32 = vld [vmem:[%s513_s0 + $0x74] sm:$0x30]  ;;  %v277_v33 = vor.u32 %v343_v26, %v276_v23  ;;  %v326_v36 = vld [vmem:[%s513_s0 + $0x78] sm:$0x30]  ;;  %v316_v37 = vld [vmem:[%s513_s0 + $0x50] sm:$0xf]  ;;  %v281_v38 = vor.u32 %v339_v27, %v278_v28 }
   0x9   :  { %174 = vmatpush.bf16.msra.mxu2 %v125_v24  ;;  %v325_v34 = vor.u32 %v353_v32, %v324_v31  ;;  %187 = vmatpush.bf16.msra.mxu3 %v128_v29  ;;  %v329_v39 = vor.u32 %v349_v35, %v326_v36  ;;  %v352_v40 = vld [vmem:[%s513_s0 + $0x6c] sm:$0x30]  ;;  %v348_v41 = vld [vmem:[%s513_s0 + $0x54] sm:$0xf]  ;;  %v15_v43 = vld [vmem:[%s515_s1] sm:$0xf] }
   0xa   :  { %v318_v42 = vld [vmem:[%s513_s0 + $0x70] sm:$0x30]  ;;  %v317_v45 = vor.u32 %v352_v40, %v316_v37  ;;  %v292_v48 = vld [vmem:[%s513_s0 + $0x18] sm:$0xf]  ;;  %v341_v51 = vld [vmem:[%s513_s0 + $0x1c] sm:$0xf] }
   0xb   :  { %149 = vmatpush.bf16.msra.mxu0 %v269_v25  ;;  %v137_v44 = vand.u32 %v325_v34, %v117_v5  ;;  %v321_v46 = vor.u32 %v348_v41, %v318_v42  ;;  %162 = vmatpush.bf16.msra.mxu1 %v273_v30  ;;  %v140_v47 = vand.u32 %v329_v39, %v117_v5  ;;  %v345_v49 = vld [vmem:[%s513_s0 + $0x34] sm:$0xf0]  ;;  %v294_v52 = vld [vmem:[%s513_s0 + $0x38] sm:$0xf0]  ;;  %v284_v54 = vld [vmem:[%s513_s0 + $0x10] sm:$0xf] }
   0xc   :  { %v131_v50 = vand.u32 %v317_v45, %v117_v5  ;;  %v344_v55 = vld [vmem:[%s513_s0 + $0x2c] sm:$0xf0]  ;;  %v293_v56 = vor.u32 %v345_v49, %v292_v48  ;;  %v340_v57 = vld [vmem:[%s513_s0 + $0x14] sm:$0xf]  ;;  %v297_v59 = vor.u32 %v341_v51, %v294_v52 }
   0xd   :  { %175 = vmatpush.bf16.msra.mxu2 %v277_v33  ;;  %188 = vmatpush.bf16.msra.mxu3 %v281_v38  ;;  %v134_v53 = vand.u32 %v321_v46, %v117_v5  ;;  %v286_v58 = vld [vmem:[%s513_s0 + $0x30] sm:$0xf0]  ;;  %v285_v60 = vor.u32 %v344_v55, %v284_v54 }
   0xe   :  { %330 = vmatmul.msk.bf16.vlgmr.msra.gmra.mxu0 %vm110_vm2, %v15_v43  ;;  %331 = vmatmul.msk.bf16.vlgmr.msra.gmra.mxu1 %vm110_vm2, %v15_v43  ;;  %v289_v61 = vor.u32 %v340_v57, %v286_v58 }
   0xf   :  { %200 = vmatpush.bf16.msrb.mxu0 %v131_v50  ;;  %213 = vmatpush.bf16.msrb.mxu1 %v134_v53 }
  0x10   :  { %332 = vmatmul.msk.bf16.vlgmr.msra.gmra.mxu2 %vm110_vm2, %v15_v43  ;;  %333 = vmatmul.msk.bf16.vlgmr.msra.gmra.mxu3 %vm110_vm2, %v15_v43 }
  0x11   :  { %226 = vmatpush.bf16.msrb.mxu2 %v137_v44  ;;  %239 = vmatpush.bf16.msrb.mxu3 %v140_v47 }
  0x13   :  { %201 = vmatpush.bf16.msrb.mxu0 %v285_v60  ;;  %214 = vmatpush.bf16.msrb.mxu1 %v289_v61 }
  0x15   :  { %227 = vmatpush.bf16.msrb.mxu2 %v293_v56  ;;  %240 = vmatpush.bf16.msrb.mxu3 %v297_v59 }
  0x1e   :  { %334 = vmatmul.msk.bf16.vlgmr.msrb.gmra.mxu0 %vm110_vm2, %v15_v43  ;;  %335 = vmatmul.msk.bf16.vlgmr.msrb.gmra.mxu1 %vm110_vm2, %v15_v43 }
  0x20   :  { %336 = vmatmul.msk.bf16.vlgmr.msrb.gmra.mxu2 %vm110_vm2, %v15_v43  ;;  %337 = vmatmul.msk.bf16.vlgmr.msrb.gmra.mxu3 %vm110_vm2, %v15_v43 }
  0x76   :  { %v36_v62 = vpop.permute.xlu0 %35 }
  0x8b   :  { %v151_v63 = vpop.f32.mrf.mxu0  ;;  %v164_v0 = vpop.f32.mrf.mxu1 }
  0x8c   :  { %v152_v1 = vadd.f32 %v151_v63, %v36_v62  ;;  %v165_v2 = vadd.f32 %v164_v0, %v36_v62 }
  0x8e   :  { %v246_v3 = vmax.f32 %v152_v1, 0.0  ;;  %v247_v4 = vmax.f32 %v165_v2, 0.0 }
  0x90   :  { %254 = vst [vmem:[%s516_s3] sm:$0xff] %v246_v3 }
  0x91   :  { %255 = vst [vmem:[%s516_s3 + $0x8] sm:$0xff] %v247_v4 }
  0x93   :  { %v177_v5 = vpop.f32.mrf.mxu2  ;;  %v153_v6 = vpop.f32.mrf.mxu0 }
  0x94   :  { %v178_v7 = vadd.f32 %v177_v5, %v36_v62  ;;  %v190_v8 = vpop.f32.mrf.mxu3  ;;  %v166_v9 = vpop.f32.mrf.mxu1 }
  0x95   :  { %v191_v10 = vadd.f32 %v190_v8, %v36_v62 }
  0x96   :  { %v248_v11 = vmax.f32 %v178_v7, 0.0 }
  0x97   :  { %v249_v12 = vmax.f32 %v191_v10, 0.0 }
  0x98   :  { %256 = vst [vmem:[%s516_s3 + $0x10] sm:$0xff] %v248_v11 }
  0x99   :  { %257 = vst [vmem:[%s516_s3 + $0x18] sm:$0xff] %v249_v12 }
  0x9b   :  { %v179_v13 = vpop.f32.mrf.mxu2  ;;  %v203_v14 = vpop.f32.mrf.mxu0 }
  0x9c   :  { %v192_v15 = vpop.f32.mrf.mxu3  ;;  %v204_v16 = vadd.f32 %v203_v14, %v36_v62  ;;  %v216_v17 = vpop.f32.mrf.mxu1 }
  0x9d   :  { %v217_v18 = vadd.f32 %v216_v17, %v36_v62 }
  0x9e   :  { %v250_v19 = vmax.f32 %v204_v16, 0.0 }
  0x9f   :  { %v251_v20 = vmax.f32 %v217_v18, 0.0 }
  0xa0   :  { %258 = vst [vmem:[%s516_s3 + $0x20] sm:$0xff] %v250_v19 }
  0xa1   :  { %259 = vst [vmem:[%s516_s3 + $0x28] sm:$0xff] %v251_v20 }
  0xa3   :  { %v229_v21 = vpop.f32.mrf.mxu2  ;;  %v205_v22 = vpop.f32.mrf.mxu0 }
  0xa4   :  { %v230_v23 = vadd.f32 %v229_v21, %v36_v62  ;;  %v242_v24 = vpop.f32.mrf.mxu3  ;;  %v218_v25 = vpop.f32.mrf.mxu1 }
  0xa5   :  { %v243_v26 = vadd.f32 %v242_v24, %v36_v62 }
  0xa6   :  { %v252_v27 = vmax.f32 %v230_v23, 0.0 }
  0xa7   :  { %v253_v28 = vmax.f32 %v243_v26, 0.0 }
  0xa8   :  { %260 = vst [vmem:[%s516_s3 + $0x30] sm:$0xff] %v252_v27 }
  0xa9   :  { %261 = vst [vmem:[%s516_s3 + $0x38] sm:$0xff] %v253_v28 }
  0xab   :  { %v231_v29 = vpop.f32.mrf.mxu2 }
  0xac   :  { %v244_v30 = vpop.f32.mrf.mxu3 }

// kernel: encoder_forward.3
= control target key start
LH: loop header
LB: loop body
LE: loop exit
PB: predicated region body
PF: predicated region fallthrough
CT: control target
= control target key end

     0   :  { %vm585_vm0 = vcmask 1043456   ;;  %vm488_vm1 = vcmask 719872   ;;  %vm1081_vm2 = vcmask 130048   ;;  %vm1105_vm3 = vcmask 261120   ;;  %s2311_s1 = inlined_call_operand.vmem [shape: bf16[216,16], index: 1, kind: input, shape index: {}]   ;;  %s2312_s0 = inlined_call_operand.vmem [shape: bf16[512,216], index: 0, kind: input, shape index: {}]   ;;  %s2313_s2 = inlined_call_operand.vmem [shape: f32[1,16], index: 2, kind: input, shape index: {}]   ;;  %s2314_s3 = inlined_call_operand.vmem [shape: f32[8,512], index: 3, kind: input, shape index: {}]   ;;  %s2315_s5 = inlined_call_operand.vmem [shape: f32[1,32], index: 5, kind: input, shape index: {}]   ;;  %s2316_s4 = inlined_call_operand.vmem [shape: f32[16,32], index: 4, kind: input, shape index: {}]   ;;  %s2317_s6 = inlined_call_operand.vmem [shape: f32[8,32], index: 6, kind: output, shape index: {}]  }
   0x1   :  { %v1523_v0 = vld [vmem:[%s2311_s1 + $0x38] sm:$0xff]  ;;  %v114_v1 = vld [vmem:[%s2311_s1 + $0x68] sm:$0xf]  ;;  %v1522_v3 = vld [vmem:[%s2311_s1 + $0x30] sm:$0xff] }
   0x2   :  { %v460_v2 = vunpack.c.l.b16 %v114_v1  ;;  %589 = vmatpush.bf16.msra.mxu0 %v1523_v0  ;;  %1529 = vmatpush.bf16.msra.mxu3 %v1523_v0  ;;  %v1528_v6 = vld [vmem:[%s2311_s1 + $0x60] sm:$0xff]  ;;  %v1521_v7 = vld [vmem:[%s2311_s1 + $0x28] sm:$0xff]  ;;  %v1527_v8 = vld [vmem:[%s2311_s1 + $0x58] sm:$0xff] }
   0x3   :  { %v1520_v9 = vld [vmem:[%s2311_s1 + $0x20] sm:$0xff]  ;;  %v1526_v10 = vld [vmem:[%s2311_s1 + $0x50] sm:$0xff]  ;;  %v1519_v11 = vld [vmem:[%s2311_s1 + $0x18] sm:$0xff] }
   0x4   :  { %v474_v4 = vpack.c.b16 %v460_v2, %v460_v2  ;;  %v1525_v12 = vld [vmem:[%s2311_s1 + $0x48] sm:$0xff]  ;;  %v1518_v13 = vld [vmem:[%s2311_s1 + $0x10] sm:$0xff]  ;;  %v1524_v14 = vld [vmem:[%s2311_s1 + $0x40] sm:$0xff] }
   0x5   :  { %v1517_v15 = vld [vmem:[%s2311_s1 + $0x8] sm:$0xff]  ;;  %v1452_v16 = vld [vmem:[%s2312_s0 + $0x4] sm:$0xf]  ;;  %v1113_v20 = vld [vmem:[%s2312_s0] sm:$0xf] }
   0x6   :  { %v587_v5 = vsel %vm585_vm0, %v474_v4, 0  ;;  %590 = vmatpush.bf16.msra.mxu0 %v1522_v3  ;;  %1530 = vmatpush.bf16.msra.mxu3 %v1522_v3  ;;  %v1115_v17 = vld [vmem:[%s2312_s0 + $0x8] sm:$0xf0]  ;;  %v1516_v19 = vld [vmem:[%s2311_s1] sm:$0xff]  ;;  %v1453_v21 = vld [vmem:[%s2312_s0 + $0x4] sm:$0xf0] }
   0x7   :  { %760 = vmatpush.bf16.msra.mxu1 %v587_v5  ;;  %1537 = vmatpush.bf16.msra.mxu2 %v587_v5  ;;  %v1118_v18 = vor.u32 %v1452_v16, %v1115_v17  ;;  %v1114_v22 = vor.u32 %v1453_v21, %v1113_v20  ;;  %v1454_v23 = vld [vmem:[%s2312_s0 + $0x14] sm:$0xf]  ;;  %v1123_v24 = vld [vmem:[%s2312_s0 + $0x18] sm:$0xf0]  ;;  %v1121_v26 = vld [vmem:[%s2312_s0 + $0x10] sm:$0xf] }
   0x8   :  { %v1126_v25 = vor.u32 %v1454_v23, %v1123_v24  ;;  %v1455_v27 = vld [vmem:[%s2312_s0 + $0x14] sm:$0xf0]  ;;  %v1257_v29 = vld [vmem:[%s2312_s0 + $0x120] sm:$0xf]  ;;  %v1489_v30 = vld [vmem:[%s2312_s0 + $0x124] sm:$0xf0] }
   0x9   :  { %v1122_v28 = vor.u32 %v1455_v27, %v1121_v26  ;;  %v1258_v31 = vor.u32 %v1489_v30, %v1257_v29  ;;  %v1488_v32 = vld [vmem:[%s2312_s0 + $0x124] sm:$0xf]  ;;  %v1259_v33 = vld [vmem:[%s2312_s0 + $0x128] sm:$0xf0]  ;;  %v1129_v38 = vld [vmem:[%s2312_s0 + $0x20] sm:$0xf] }
   0xa   :  { %591 = vmatpush.bf16.msra.mxu0 %v1521_v7  ;;  %1531 = vmatpush.bf16.msra.mxu3 %v1521_v7  ;;  %v1262_v34 = vor.u32 %v1488_v32, %v1259_v33  ;;  %v1456_v35 = vld [vmem:[%s2312_s0 + $0x24] sm:$0xf]  ;;  %v1131_v36 = vld [vmem:[%s2312_s0 + $0x28] sm:$0xf0]  ;;  %v1457_v39 = vld [vmem:[%s2312_s0 + $0x24] sm:$0xf0] }
   0xb   :  { %761 = vmatpush.bf16.msra.mxu1 %v1528_v6  ;;  %1538 = vmatpush.bf16.msra.mxu2 %v1528_v6  ;;  %v1134_v37 = vor.u32 %v1456_v35, %v1131_v36  ;;  %v1130_v40 = vor.u32 %v1457_v39, %v1129_v38  ;;  %v1265_v41 = vld [vmem:[%s2312_s0 + $0x130] sm:$0xf]  ;;  %v1491_v42 = vld [vmem:[%s2312_s0 + $0x134] sm:$0xf0]  ;;  %v1490_v44 = vld [vmem:[%s2312_s0 + $0x134] sm:$0xf] }
   0xc   :  { %v1266_v43 = vor.u32 %v1491_v42, %v1265_v41  ;;  %v1267_v45 = vld [vmem:[%s2312_s0 + $0x138] sm:$0xf0]  ;;  %v1458_v47 = vld [vmem:[%s2312_s0 + $0x34] sm:$0xf]  ;;  %v1137_v50 = vld [vmem:[%s2312_s0 + $0x30] sm:$0xf] }
   0xd   :  { %v1270_v46 = vor.u32 %v1490_v44, %v1267_v45  ;;  %v1139_v48 = vld [vmem:[%s2312_s0 + $0x38] sm:$0xf0]  ;;  %v1459_v51 = vld [vmem:[%s2312_s0 + $0x34] sm:$0xf0]  ;;  %v1273_v53 = vld [vmem:[%s2312_s0 + $0x140] sm:$0xf] }
   0xe   :  { %592 = vmatpush.bf16.msra.mxu0 %v1520_v9  ;;  %1532 = vmatpush.bf16.msra.mxu3 %v1520_v9  ;;  %v1142_v49 = vor.u32 %v1458_v47, %v1139_v48  ;;  %v1138_v52 = vor.u32 %v1459_v51, %v1137_v50  ;;  %v1493_v54 = vld [vmem:[%s2312_s0 + $0x144] sm:$0xf0]  ;;  %v1492_v56 = vld [vmem:[%s2312_s0 + $0x144] sm:$0xf]  ;;  %v1275_v57 = vld [vmem:[%s2312_s0 + $0x148] sm:$0xf0] }
   0xf   :  { %762 = vmatpush.bf16.msra.mxu1 %v1527_v8  ;;  %1539 = vmatpush.bf16.msra.mxu2 %v1527_v8  ;;  %v1274_v55 = vor.u32 %v1493_v54, %v1273_v53  ;;  %v1278_v58 = vor.u32 %v1492_v56, %v1275_v57  ;;  %v1460_v59 = vld [vmem:[%s2312_s0 + $0x44] sm:$0xf]  ;;  %v1147_v60 = vld [vmem:[%s2312_s0 + $0x48] sm:$0xf0]  ;;  %v1145_v62 = vld [vmem:[%s2312_s0 + $0x40] sm:$0xf] }
  0x10   :  { %v1150_v61 = vor.u32 %v1460_v59, %v1147_v60  ;;  %v1461_v63 = vld [vmem:[%s2312_s0 + $0x44] sm:$0xf0]  ;;  %v1281_v1 = vld [vmem:[%s2312_s0 + $0x150] sm:$0xf]  ;;  %v1495_v2 = vld [vmem:[%s2312_s0 + $0x154] sm:$0xf0] }
  0x11   :  { %v1146_v0 = vor.u32 %v1461_v63, %v1145_v62  ;;  %v1282_v3 = vor.u32 %v1495_v2, %v1281_v1  ;;  %v1494_v4 = vld [vmem:[%s2312_s0 + $0x154] sm:$0xf]  ;;  %v1283_v5 = vld [vmem:[%s2312_s0 + $0x158] sm:$0xf0]  ;;  %v1496_v16 = vld [vmem:[%s2312_s0 + $0x164] sm:$0xf] }
  0x12   :  { %593 = vmatpush.bf16.msra.mxu0 %v1519_v11  ;;  %1533 = vmatpush.bf16.msra.mxu3 %v1519_v11  ;;  %v1286_v6 = vor.u32 %v1494_v4, %v1283_v5  ;;  %v1462_v7 = vld [vmem:[%s2312_s0 + $0x54] sm:$0xf]  ;;  %v1155_v8 = vld [vmem:[%s2312_s0 + $0x58] sm:$0xf0]  ;;  %v1463_v11 = vld [vmem:[%s2312_s0 + $0x54] sm:$0xf0] }
  0x13   :  { %763 = vmatpush.bf16.msra.mxu1 %v1526_v10  ;;  %1540 = vmatpush.bf16.msra.mxu2 %v1526_v10  ;;  %v1158_v9 = vor.u32 %v1462_v7, %v1155_v8  ;;  %v1153_v10 = vld [vmem:[%s2312_s0 + $0x50] sm:$0xf]  ;;  %v1291_v17 = vld [vmem:[%s2312_s0 + $0x168] sm:$0xf0]  ;;  %v1465_v23 = vld [vmem:[%s2312_s0 + $0x64] sm:$0xf0] }
  0x14   :  { %v1163_v20 = vld [vmem:[%s2312_s0 + $0x68] sm:$0xf0]  ;;  %v1499_v26 = vld [vmem:[%s2312_s0 + $0x174] sm:$0xf0]  ;;  %v1299_v29 = vld [vmem:[%s2312_s0 + $0x178] sm:$0xf0] }
  0x15   :  { %v1171_v32 = vld [vmem:[%s2312_s0 + $0x78] sm:$0xf0]  ;;  %v1467_v35 = vld [vmem:[%s2312_s0 + $0x74] sm:$0xf0]  ;;  %v1501_v38 = vld [vmem:[%s2312_s0 + $0x184] sm:$0xf0] }
  0x16   :  { %594 = vmatpush.bf16.msra.mxu0 %v1518_v13  ;;  %1534 = vmatpush.bf16.msra.mxu3 %v1518_v13  ;;  %v1289_v13 = vld [vmem:[%s2312_s0 + $0x160] sm:$0xf]  ;;  %v1307_v41 = vld [vmem:[%s2312_s0 + $0x188] sm:$0xf0]  ;;  %v1469_v48 = vld [vmem:[%s2312_s0 + $0x84] sm:$0xf0] }
  0x17   :  { %764 = vmatpush.bf16.msra.mxu1 %v1525_v12  ;;  %1541 = vmatpush.bf16.msra.mxu2 %v1525_v12  ;;  %v1154_v12 = vor.u32 %v1463_v11, %v1153_v10  ;;  %v1179_v44 = vld [vmem:[%s2312_s0 + $0x88] sm:$0xf0]  ;;  %v1177_v47 = vld [vmem:[%s2312_s0 + $0x80] sm:$0xf]  ;;  %v1313_v53 = vld [vmem:[%s2312_s0 + $0x190] sm:$0xf] }
  0x18   :  { %v1178_v50 = vor.u32 %v1469_v48, %v1177_v47  ;;  %v1503_v54 = vld [vmem:[%s2312_s0 + $0x194] sm:$0xf0]  ;;  %v1502_v56 = vld [vmem:[%s2312_s0 + $0x194] sm:$0xf]  ;;  %v1315_v57 = vld [vmem:[%s2312_s0 + $0x198] sm:$0xf0] }
  0x19   :  { %v1318_v60 = vor.u32 %v1502_v56, %v1315_v57  ;;  %v1470_v62 = vld [vmem:[%s2312_s0 + $0x94] sm:$0xf]  ;;  %v1187_v63 = vld [vmem:[%s2312_s0 + $0x98] sm:$0xf0]  ;;  %v1185_v4 = vld [vmem:[%s2312_s0 + $0x90] sm:$0xf] }
  0x1a   :  { %595 = vmatpush.bf16.msra.mxu0 %v1517_v15  ;;  %1535 = vmatpush.bf16.msra.mxu3 %v1517_v15  ;;  %v1190_v1 = vor.u32 %v1470_v62, %v1187_v63  ;;  %v1471_v5 = vld [vmem:[%s2312_s0 + $0x94] sm:$0xf0]  ;;  %v1505_v10 = vld [vmem:[%s2312_s0 + $0x1a4] sm:$0xf0]  ;;  %v1474_v47 = vld [vmem:[%s2312_s0 + $0xb4] sm:$0xf] }
  0x1b   :  { %765 = vmatpush.bf16.msra.mxu1 %v1524_v14  ;;  %1542 = vmatpush.bf16.msra.mxu2 %v1524_v14  ;;  %v1497_v14 = vld [vmem:[%s2312_s0 + $0x164] sm:$0xf0]  ;;  %v1203_v48 = vld [vmem:[%s2312_s0 + $0xb8] sm:$0xf0]  ;;  %v1475_v56 = vld [vmem:[%s2312_s0 + $0xb4] sm:$0xf0] }
  0x1c   :  { %v1290_v15 = vor.u32 %v1497_v14, %v1289_v13  ;;  %v1323_v13 = vld [vmem:[%s2312_s0 + $0x1a8] sm:$0xf0] }
  0x1e   :  { %1419 = vmatmul.msk.bf16.vlgmr.msra.gmra.mxu1 %vm488_vm1, %v1118_v18  ;;  %596 = vmatpush.bf16.msra.mxu0 %v1516_v19  ;;  %v1294_v18 = vor.u32 %v1496_v16, %v1291_v17 }
  0x1f   :  { %1536 = vmatpush.bf16.msra.mxu3 %v1516_v19  ;;  %1437 = vmatmul.msk.bf16.vlgmr.msra.gmra.mxu2 %vm488_vm1, %v1262_v34  ;;  %v1464_v19 = vld [vmem:[%s2312_s0 + $0x64] sm:$0xf]  ;;  %v1169_v34 = vld [vmem:[%s2312_s0 + $0x70] sm:$0xf] }
  0x20   :  { %v1166_v21 = vor.u32 %v1464_v19, %v1163_v20  ;;  %v1170_v36 = vor.u32 %v1467_v35, %v1169_v34  ;;  %v1472_v19 = vld [vmem:[%s2312_s0 + $0xa4] sm:$0xf]  ;;  %v1195_v20 = vld [vmem:[%s2312_s0 + $0xa8] sm:$0xf0]  ;;  %v1329_v34 = vld [vmem:[%s2312_s0 + $0x1b0] sm:$0xf] }
  0x21   :  { %597 = vmatmul.bf16.vlgmr.msra.gmra.mxu0 %v1114_v22  ;;  %v1161_v22 = vld [vmem:[%s2312_s0 + $0x60] sm:$0xf]  ;;  %v1507_v35 = vld [vmem:[%s2312_s0 + $0x1b4] sm:$0xf0] }
  0x22   :  { %687 = vmatmul.bf16.vlgmr.msra.gmra.mxu3 %v1258_v31  ;;  %v1162_v24 = vor.u32 %v1465_v23, %v1161_v22  ;;  %v1466_v31 = vld [vmem:[%s2312_s0 + $0x74] sm:$0xf]  ;;  %v1198_v23 = vor.u32 %v1472_v19, %v1195_v20 }
  0x23   :  { %v1174_v33 = vor.u32 %v1466_v31, %v1171_v32 }
  0x2e   :  { %1420 = vmatmul.msk.bf16.gmra.mxu1 %vm488_vm1, %v1126_v25  ;;  %v1297_v25 = vld [vmem:[%s2312_s0 + $0x170] sm:$0xf] }
  0x2f   :  { %1438 = vmatmul.msk.bf16.gmra.mxu2 %vm488_vm1, %v1270_v46  ;;  %v1298_v27 = vor.u32 %v1499_v26, %v1297_v25  ;;  %v1193_v26 = vld [vmem:[%s2312_s0 + $0xa0] sm:$0xf] }
  0x31   :  { %602 = vmatmul.bf16.gmra.mxu0 %v1122_v28  ;;  %v1498_v28 = vld [vmem:[%s2312_s0 + $0x174] sm:$0xf] }
  0x32   :  { %692 = vmatmul.bf16.gmra.mxu3 %v1266_v43  ;;  %v1302_v30 = vor.u32 %v1498_v28, %v1299_v29  ;;  %v1468_v43 = vld [vmem:[%s2312_s0 + $0x84] sm:$0xf] }
  0x33   :  { %v1182_v45 = vor.u32 %v1468_v43, %v1179_v44 }
  0x3e   :  { %1421 = vmatmul.msk.bf16.gmra.mxu1 %vm488_vm1, %v1134_v37  ;;  %v1305_v37 = vld [vmem:[%s2312_s0 + $0x180] sm:$0xf] }
  0x3f   :  { %1439 = vmatmul.msk.bf16.gmra.mxu2 %vm488_vm1, %v1278_v58  ;;  %v1306_v39 = vor.u32 %v1501_v38, %v1305_v37  ;;  %v1330_v38 = vor.u32 %v1507_v35, %v1329_v34  ;;  %v1347_v34 = vld [vmem:[%s2312_s0 + $0x1d8] sm:$0xf0] }
  0x41   :  { %607 = vmatmul.bf16.gmra.mxu0 %v1130_v40  ;;  %v1500_v40 = vld [vmem:[%s2312_s0 + $0x184] sm:$0xf] }
  0x42   :  { %697 = vmatmul.bf16.gmra.mxu3 %v1274_v55  ;;  %v1310_v42 = vor.u32 %v1500_v40, %v1307_v41  ;;  %v1314_v55 = vor.u32 %v1503_v54, %v1313_v53  ;;  %v1506_v40 = vld [vmem:[%s2312_s0 + $0x1b4] sm:$0xf]  ;;  %v1331_v41 = vld [vmem:[%s2312_s0 + $0x1b8] sm:$0xf0] }
  0x43   :  { %v1334_v44 = vor.u32 %v1506_v40, %v1331_v41 }
  0x4e   :  { %1422 = vmatmul.msk.bf16.gmra.mxu1 %vm488_vm1, %v1142_v49  ;;  %v1832_v49 = vld [vmem:[%s2313_s2] ss:$0 sm:$0xff] }
  0x4f   :  { %1440 = vmatmul.msk.bf16.gmra.mxu2 %vm488_vm1, %v1286_v6  ;;  %v1186_v6 = vor.u32 %v1471_v5, %v1185_v4 }
  0x51   :  { %612 = vmatmul.bf16.gmra.mxu0 %v1138_v52 }
  0x52   :  { %702 = vmatmul.bf16.gmra.mxu3 %v1282_v3 }
  0x5e   :  { %1423 = vmatmul.msk.bf16.gmra.mxu1 %vm488_vm1, %v1150_v61 }
  0x5f   :  { %1441 = vmatmul.msk.bf16.gmra.mxu2 %vm488_vm1, %v1294_v18 }
  0x61   :  { %617 = vmatmul.bf16.gmra.mxu0 %v1146_v0 }
  0x62   :  { %707 = vmatmul.bf16.gmra.mxu3 %v1290_v15 }
  0x6e   :  { %1424 = vmatmul.msk.bf16.gmra.mxu1 %vm488_vm1, %v1158_v9  ;;  %v1321_v9 = vld [vmem:[%s2312_s0 + $0x1a0] sm:$0xf] }
  0x6f   :  { %1442 = vmatmul.msk.bf16.gmra.mxu2 %vm488_vm1, %v1302_v30  ;;  %v1322_v11 = vor.u32 %v1505_v10, %v1321_v9 }
  0x71   :  { %622 = vmatmul.bf16.gmra.mxu0 %v1154_v12  ;;  %v1504_v12 = vld [vmem:[%s2312_s0 + $0x1a4] sm:$0xf] }
  0x72   :  { %712 = vmatmul.bf16.gmra.mxu3 %v1298_v27  ;;  %v1326_v16 = vor.u32 %v1504_v12, %v1323_v13  ;;  %v1473_v27 = vld [vmem:[%s2312_s0 + $0xa4] sm:$0xf0] }
  0x73   :  { %v1194_v28 = vor.u32 %v1473_v27, %v1193_v26 }
  0x7e   :  { %1425 = vmatmul.msk.bf16.gmra.mxu1 %vm488_vm1, %v1166_v21 }
  0x7f   :  { %1443 = vmatmul.msk.bf16.gmra.mxu2 %vm488_vm1, %v1310_v42 }
  0x81   :  { %627 = vmatmul.bf16.gmra.mxu0 %v1162_v24 }
  0x82   :  { %717 = vmatmul.bf16.gmra.mxu3 %v1306_v39 }
  0x8e   :  { %1426 = vmatmul.msk.bf16.gmra.mxu1 %vm488_vm1, %v1174_v33 }
  0x8f   :  { %1444 = vmatmul.msk.bf16.gmra.mxu2 %vm488_vm1, %v1318_v60 }
  0x91   :  { %632 = vmatmul.bf16.gmra.mxu0 %v1170_v36 }
  0x92   :  { %722 = vmatmul.bf16.gmra.mxu3 %v1314_v55  ;;  %v1201_v55 = vld [vmem:[%s2312_s0 + $0xb0] sm:$0xf] }
  0x93   :  { %v1202_v57 = vor.u32 %v1475_v56, %v1201_v55  ;;  %v1353_v55 = vld [vmem:[%s2312_s0 + $0x1e0] sm:$0xf]  ;;  %v1513_v56 = vld [vmem:[%s2312_s0 + $0x1e4] sm:$0xf0] }
  0x9b   :  { %v767_v46 = vpop.f32.mrf.mxu1 }
  0x9e   :  { %1427 = vmatmul.msk.bf16.gmra.mxu1 %vm488_vm1, %v1182_v45  ;;  %v598_v51 = vpop.f32.mrf.mxu0 }
  0x9f   :  { %v599_v52 = vadd.f32 %v1832_v49, %v598_v51  ;;  %1445 = vmatmul.msk.bf16.gmra.mxu2 %vm488_vm1, %v1326_v16  ;;  %v1211_v16 = vld [vmem:[%s2312_s0 + $0xc8] sm:$0xf0] }
  0xa1   :  { %637 = vmatmul.bf16.gmra.mxu0 %v1178_v50  ;;  %v1848_v58 = vadd.f32 %v767_v46, %v599_v52  ;;  %v1206_v52 = vor.u32 %v1474_v47, %v1203_v48  ;;  %v1217_v48 = vld [vmem:[%s2312_s0 + $0xd0] sm:$0xf] }
  0xa2   :  { %727 = vmatmul.bf16.gmra.mxu3 %v1322_v11  ;;  %v857_v22 = vpop.f32.mrf.mxu2 }
  0xa3   :  { %v769_v59 = vpop.f32.mrf.mxu1 }
  0xa5   :  { %v688_v17 = vpop.f32.mrf.mxu3 }
  0xa6   :  { %v600_v61 = vpop.f32.mrf.mxu0  ;;  %v689_v31 = vadd.f32 %v1832_v49, %v688_v17 }
  0xa7   :  { %v601_v0 = vadd.f32 %v1832_v49, %v600_v61 }
  0xa8   :  { %v1908_v36 = vadd.f32 %v857_v22, %v689_v31  ;;  %v1209_v22 = vld [vmem:[%s2312_s0 + $0xc0] sm:$0xf] }
  0xa9   :  { %v1858_v2 = vadd.f32 %v769_v59, %v601_v0  ;;  %v1337_v0 = vld [vmem:[%s2312_s0 + $0x1c0] sm:$0xf] }
  0xaa   :  { %v859_v37 = vpop.f32.mrf.mxu2 }
  0xab   :  { %v772_v3 = vpop.f32.mrf.mxu1 }
  0xad   :  { %v690_v29 = vpop.f32.mrf.mxu3 }
  0xae   :  { %1428 = vmatmul.msk.bf16.gmra.mxu1 %vm488_vm1, %v1190_v1  ;;  %v603_v7 = vpop.f32.mrf.mxu0  ;;  %v691_v32 = vadd.f32 %v1832_v49, %v690_v29  ;;  %v1509_v1 = vld [vmem:[%s2312_s0 + $0x1c4] sm:$0xf0]  ;;  %v1345_v29 = vld [vmem:[%s2312_s0 + $0x1d0] sm:$0xf] }
  0xaf   :  { %v604_v8 = vadd.f32 %v1832_v49, %v603_v7  ;;  %1446 = vmatmul.msk.bf16.gmra.mxu2 %vm488_vm1, %v1334_v44  ;;  %v1338_v5 = vor.u32 %v1509_v1, %v1337_v0  ;;  %v1508_v7 = vld [vmem:[%s2312_s0 + $0x1c4] sm:$0xf]  ;;  %v1219_v44 = vld [vmem:[%s2312_s0 + $0xd8] sm:$0xf0] }
  0xb0   :  { %v1910_v39 = vadd.f32 %v859_v37, %v691_v32 }
  0xb1   :  { %642 = vmatmul.bf16.gmra.mxu0 %v1186_v6  ;;  %v1880_v14 = vadd.f32 %v772_v3, %v604_v8  ;;  %v1339_v8 = vld [vmem:[%s2312_s0 + $0x1c8] sm:$0xf0] }
  0xb2   :  { %732 = vmatmul.bf16.gmra.mxu3 %v1330_v38  ;;  %v862_v51 = vpop.f32.mrf.mxu2  ;;  %v1342_v11 = vor.u32 %v1508_v7, %v1339_v8 }
  0xb3   :  { %v774_v15 = vpop.f32.mrf.mxu1 }
  0xb5   :  { %v693_v45 = vpop.f32.mrf.mxu3 }
  0xb6   :  { %v605_v18 = vpop.f32.mrf.mxu0  ;;  %v694_v61 = vadd.f32 %v1832_v49, %v693_v45 }
  0xb7   :  { %v606_v21 = vadd.f32 %v1832_v49, %v605_v18 }
  0xb8   :  { %v1946_v3 = vadd.f32 %v862_v51, %v694_v61  ;;  %v1355_v61 = vld [vmem:[%s2312_s0 + $0x1e8] sm:$0xf0] }
  0xb9   :  { %v1890_v24 = vadd.f32 %v774_v15, %v606_v21  ;;  %v1476_v15 = vld [vmem:[%s2312_s0 + $0xc4] sm:$0xf] }
  0xba   :  { %v864_v4 = vpop.f32.mrf.mxu2  ;;  %v1214_v19 = vor.u32 %v1476_v15, %v1211_v16 }
  0xbb   :  { %v777_v25 = vpop.f32.mrf.mxu1 }
  0xbd   :  { %v695_v59 = vpop.f32.mrf.mxu3 }
  0xbe   :  { %1429 = vmatmul.msk.bf16.gmra.mxu1 %vm488_vm1, %v1198_v23  ;;  %v608_v30 = vpop.f32.mrf.mxu0  ;;  %v696_v62 = vadd.f32 %v1832_v49, %v695_v59  ;;  %v1477_v23 = vld [vmem:[%s2312_s0 + $0xc4] sm:$0xf0]  ;;  %v1354_v59 = vor.u32 %v1513_v56, %v1353_v55 }
  0xbf   :  { %v609_v33 = vadd.f32 %v1832_v49, %v608_v30  ;;  %1447 = vmatmul.msk.bf16.gmra.mxu2 %vm488_vm1, %v1342_v11  ;;  %v1511_v30 = vld [vmem:[%s2312_s0 + $0x1d4] sm:$0xf0]  ;;  %v1225_v11 = vld [vmem:[%s2312_s0 + $0xe0] sm:$0xf] }
  0xc0   :  { %v1948_v6 = vadd.f32 %v864_v4, %v696_v62  ;;  %v1346_v32 = vor.u32 %v1511_v30, %v1345_v29  ;;  %v1480_v4 = vld [vmem:[%s2312_s0 + $0xe4] sm:$0xf] }
  0xc1   :  { %647 = vmatmul.bf16.gmra.mxu0 %v1194_v28  ;;  %v1918_v42 = vadd.f32 %v777_v25, %v609_v33  ;;  %v1210_v25 = vor.u32 %v1477_v23, %v1209_v22  ;;  %v1510_v33 = vld [vmem:[%s2312_s0 + $0x1d4] sm:$0xf] }
  0xc2   :  { %737 = vmatmul.bf16.gmra.mxu3 %v1338_v5  ;;  %v1968_v18 = vpop.f32.mrf.mxu2  ;;  %v1350_v38 = vor.u32 %v1510_v33, %v1347_v34  ;;  %v1227_v5 = vld [vmem:[%s2312_s0 + $0xe8] sm:$0xf0]  ;;  %v1482_v33 = vld [vmem:[%s2312_s0 + $0xf4] sm:$0xf]  ;;  %v1235_v34 = vld [vmem:[%s2312_s0 + $0xf8] sm:$0xf0] }
  0xc3   :  { %v779_v43 = vpop.f32.mrf.mxu1  ;;  %v1230_v8 = vor.u32 %v1480_v4, %v1227_v5  ;;  %v1484_v4 = vld [vmem:[%s2312_s0 + $0x104] sm:$0xf]  ;;  %v1243_v5 = vld [vmem:[%s2312_s0 + $0x108] sm:$0xf0] }
  0xc5   :  { %v1959_v12 = vpop.f32.mrf.mxu3 }
  0xc6   :  { %v610_v46 = vpop.f32.mrf.mxu0 }
  0xc7   :  { %v611_v50 = vadd.f32 %v1832_v49, %v610_v46 }
  0xc9   :  { %v1928_v53 = vadd.f32 %v779_v43, %v611_v50  ;;  %v1478_v43 = vld [vmem:[%s2312_s0 + $0xd4] sm:$0xf]  ;;  %v1479_v50 = vld [vmem:[%s2312_s0 + $0xd4] sm:$0xf0] }
  0xca   :  { %v1988_v31 = vpop.f32.mrf.mxu2  ;;  %v1222_v46 = vor.u32 %v1478_v43, %v1219_v44  ;;  %v1218_v51 = vor.u32 %v1479_v50, %v1217_v48  ;;  %v1238_v43 = vor.u32 %v1482_v33, %v1235_v34  ;;  %v1483_v48 = vld [vmem:[%s2312_s0 + $0xf4] sm:$0xf0] }
  0xcb   :  { %v782_v54 = vpop.f32.mrf.mxu1 }
  0xcd   :  { %v1979_v26 = vpop.f32.mrf.mxu3 }
  0xce   :  { %1430 = vmatmul.msk.bf16.gmra.mxu1 %vm488_vm1, %v1206_v52  ;;  %v613_v60 = vpop.f32.mrf.mxu0 }
  0xcf   :  { %v614_v63 = vadd.f32 %v1832_v49, %v613_v60  ;;  %1448 = vmatmul.msk.bf16.gmra.mxu2 %vm488_vm1, %v1350_v38  ;;  %v1512_v60 = vld [vmem:[%s2312_s0 + $0x1e4] sm:$0xf] }
  0xd1   :  { %652 = vmatmul.bf16.gmra.mxu0 %v1202_v57  ;;  %v1956_v9 = vadd.f32 %v782_v54, %v614_v63  ;;  %v1358_v63 = vor.u32 %v1512_v60, %v1355_v61 }
  0xd2   :  { %742 = vmatmul.bf16.gmra.mxu3 %v1346_v32  ;;  %v2011_v45 = vpop.f32.mrf.mxu2 }
  0xd3   :  { %v784_v10 = vpop.f32.mrf.mxu1 }
  0xd5   :  { %v2001_v40 = vpop.f32.mrf.mxu3 }
  0xd6   :  { %v615_v13 = vpop.f32.mrf.mxu0 }
  0xd7   :  { %v616_v17 = vadd.f32 %v1832_v49, %v615_v13  ;;  %v1481_v13 = vld [vmem:[%s2312_s0 + $0xe4] sm:$0xf0] }
  0xd8   :  { %v1226_v15 = vor.u32 %v1481_v13, %v1225_v11 }
  0xd9   :  { %v1970_v20 = vadd.f32 %v784_v10, %v616_v17 }
  0xda   :  { %v2032_v57 = vpop.f32.mrf.mxu2 }
  0xdb   :  { %v787_v21 = vpop.f32.mrf.mxu1 }
  0xdd   :  { %v2022_v52 = vpop.f32.mrf.mxu3 }
  0xde   :  { %1431 = vmatmul.msk.bf16.gmra.mxu1 %vm488_vm1, %v1214_v19  ;;  %v618_v27 = vpop.f32.mrf.mxu0  ;;  %v1361_v19 = vld [vmem:[%s2312_s0 + $0x1f0] sm:$0xf] }
  0xdf   :  { %v619_v28 = vadd.f32 %v1832_v49, %v618_v27  ;;  %1449 = vmatmul.msk.bf16.gmra.mxu2 %vm488_vm1, %v1358_v63  ;;  %v1363_v27 = vld [vmem:[%s2312_s0 + $0x1f8] sm:$0xf0] }
  0xe1   :  { %657 = vmatmul.bf16.gmra.mxu0 %v1210_v25  ;;  %v1996_v35 = vadd.f32 %v787_v21, %v619_v28  ;;  %v1515_v21 = vld [vmem:[%s2312_s0 + $0x1f4] sm:$0xf0]  ;;  %v1514_v25 = vld [vmem:[%s2312_s0 + $0x1f4] sm:$0xf] }
  0xe2   :  { %747 = vmatmul.bf16.gmra.mxu3 %v1354_v59  ;;  %v2051_v7 = vpop.f32.mrf.mxu2  ;;  %v1362_v23 = vor.u32 %v1515_v21, %v1361_v19  ;;  %v1366_v29 = vor.u32 %v1514_v25, %v1363_v27  ;;  %v1241_v27 = vld [vmem:[%s2312_s0 + $0x100] sm:$0xf] }
  0xe3   :  { %v1998_v37 = vpop.f32.mrf.mxu1 }
  0xe5   :  { %v2043_v0 = vpop.f32.mrf.mxu3 }
  0xe6   :  { %v2003_v41 = vpop.f32.mrf.mxu0 }
  0xea   :  { %v2068_v22 = vpop.f32.mrf.mxu2 }
  0xeb   :  { %v2013_v47 = vpop.f32.mrf.mxu1 }
  0xed   :  { %v2060_v16 = vpop.f32.mrf.mxu3 }
  0xee   :  { %1432 = vmatmul.msk.bf16.gmra.mxu1 %vm488_vm1, %v1222_v46  ;;  %v2024_v54 = vpop.f32.mrf.mxu0  ;;  %v1233_v46 = vld [vmem:[%s2312_s0 + $0xf0] sm:$0xf] }
  0xef   :  { %1450 = vmatmul.msk.bf16.gmra.mxu2 %vm488_vm1, %v1366_v29  ;;  %v1234_v50 = vor.u32 %v1483_v48, %v1233_v46  ;;  %v1485_v29 = vld [vmem:[%s2312_s0 + $0x104] sm:$0xf0] }
  0xf0   :  { %v1242_v48 = vor.u32 %v1485_v29, %v1241_v27 }
  0xf1   :  { %662 = vmatmul.bf16.gmra.mxu0 %v1218_v51 }
  0xf2   :  { %752 = vmatmul.bf16.gmra.mxu3 %v1362_v23  ;;  %v2085_v38 = vpop.f32.mrf.mxu2  ;;  %v1246_v23 = vor.u32 %v1484_v4, %v1243_v5 }
  0xf3   :  { %v2040_v62 = vpop.f32.mrf.mxu1 }
  0xf5   :  { %v2077_v30 = vpop.f32.mrf.mxu3 }
  0xf6   :  { %v625_v1 = vpop.f32.mrf.mxu0 }
  0xf7   :  { %v626_v33 = vadd.f32 %v1832_v49, %v625_v1  ;;  %v621_v1 = vadd.f32 %v1832_v49, %v2003_v41 }
  0xfa   :  { %v2096_v56 = vpop.f32.mrf.mxu2 }
  0xfb   :  { %v797_v10 = vpop.f32.mrf.mxu1 }
  0xfd   :  { %v2094_v51 = vpop.f32.mrf.mxu3 }
  0xfe   :  { %1433 = vmatmul.msk.bf16.gmra.mxu1 %vm488_vm1, %v1230_v8  ;;  %v628_v17 = vpop.f32.mrf.mxu0 }
 0x101   :  { %667 = vmatmul.bf16.gmra.mxu0 %v1226_v15  ;;  %v629_v15 = vadd.f32 %v1832_v49, %v628_v17 }
 0x102   :  { %v887_v13 = vpop.f32.mrf.mxu2 }
 0x103   :  { %v799_v28 = vpop.f32.mrf.mxu1 }
 0x105   :  { %v718_v61 = vpop.f32.mrf.mxu3 }
 0x106   :  { %v630_v32 = vpop.f32.mrf.mxu0 }
 0x107   :  { %v631_v8 = vadd.f32 %v1832_v49, %v630_v32 }
 0x109   :  { %v800_v34 = vadd.f32 %v799_v28, %v631_v8 }
 0x10b   :  { %v802_v44 = vpop.f32.mrf.mxu1 }
 0x10d   :  { %v720_v46 = vpop.f32.mrf.mxu3 }
 0x10e   :  { %1434 = vmatmul.msk.bf16.gmra.mxu1 %vm488_vm1, %v1238_v43  ;;  %v633_v55 = vpop.f32.mrf.mxu0  ;;  %v624_v43 = vadd.f32 %v1832_v49, %v2024_v54  ;;  %v795_v54 = vadd.f32 %v2040_v62, %v626_v33 }
 0x10f   :  { %v634_v60 = vadd.f32 %v1832_v49, %v633_v55  ;;  %v719_v55 = vadd.f32 %v1832_v49, %v718_v61 }
 0x110   :  { %v793_v5 = vadd.f32 %v2013_v47, %v624_v43  ;;  %v938_v41 = vmax.f32 %v795_v54, 0.0  ;;  %v1251_v47 = vld [vmem:[%s2312_s0 + $0x118] sm:$0xf0]  ;;  %v1487_v43 = vld [vmem:[%s2312_s0 + $0x114] sm:$0xf0] }
 0x111   :  { %672 = vmatmul.bf16.gmra.mxu0 %v1234_v50  ;;  %v803_v21 = vadd.f32 %v802_v44, %v634_v60  ;;  %v798_v44 = vadd.f32 %v797_v10, %v629_v15  ;;  %v940_v60 = vmax.f32 %v800_v34, 0.0  ;;  %v889_v10 = vpop.f32.mrf.mxu2  ;;  %v790_v15 = vadd.f32 %v1998_v37, %v621_v1  ;;  %v1249_v34 = vld [vmem:[%s2312_s0 + $0x110] sm:$0xf] }
 0x112   :  { %v935_v37 = vmax.f32 %v1996_v35, 0.0  ;;  %v1250_v35 = vor.u32 %v1487_v43, %v1249_v34  ;;  %v932_v1 = vmax.f32 %v1928_v53, 0.0  ;;  %v714_v53 = vadd.f32 %v1832_v49, %v2077_v30 }
 0x113   :  { %v804_v59 = vpop.f32.mrf.mxu1  ;;  %v941_v17 = vmax.f32 %v803_v21, 0.0  ;;  %v939_v4 = vmax.f32 %v798_v44, 0.0  ;;  %v1486_v21 = vld [vmem:[%s2312_s0 + $0x114] sm:$0xf]  ;;  %v933_v44 = vmax.f32 %v1956_v9, 0.0  ;;  %v931_v9 = vmax.f32 %v1918_v42, 0.0 }
 0x114   :  { %v1254_v33 = vor.u32 %v1486_v21, %v1251_v47  ;;  %v883_v30 = vadd.f32 %v2085_v38, %v714_v53 }
 0x115   :  { %v723_v62 = vpop.f32.mrf.mxu3 }
 0x116   :  { %v635_v63 = vpop.f32.mrf.mxu0  ;;  %v973_v38 = vmax.f32 %v883_v30, 0.0 }
 0x117   :  { %v636_v11 = vadd.f32 %v1832_v49, %v635_v63  ;;  %v2124_v63 = vadd.f32 %v887_v13, %v719_v55 }
 0x119   :  { %v805_v19 = vadd.f32 %v804_v59, %v636_v11  ;;  %v721_v59 = vadd.f32 %v1832_v49, %v720_v46  ;;  %v892_v27 = vpop.f32.mrf.mxu2 }
 0x11b   :  { %v807_v25 = vpop.f32.mrf.mxu1  ;;  %v942_v32 = vmax.f32 %v805_v19, 0.0  ;;  %v2127_v8 = vadd.f32 %v889_v10, %v721_v59  ;;  %v937_v19 = vmax.f32 %v793_v5, 0.0  ;;  %v930_v5 = vmax.f32 %v1890_v24, 0.0 }
 0x11c   :  { %v709_v24 = vadd.f32 %v1832_v49, %v2043_v0 }
 0x11d   :  { %995 = vmatpush.msrb.mxu2 %v942_v32  ;;  %v725_v46 = vpop.f32.mrf.mxu3 }
 0x11e   :  { %1435 = vmatmul.msk.bf16.gmra.mxu1 %vm488_vm1, %v1246_v23  ;;  %v638_v50 = vpop.f32.mrf.mxu0  ;;  %v726_v55 = vadd.f32 %v1832_v49, %v725_v46  ;;  %v878_v0 = vadd.f32 %v2051_v7, %v709_v24 }
 0x11f   :  { %v639_v28 = vadd.f32 %v1832_v49, %v638_v50  ;;  %996 = vmatpush.msrb.mxu2 %v941_v17  ;;  %v934_v17 = vmax.f32 %v1970_v20, 0.0  ;;  %v724_v50 = vadd.f32 %v1832_v49, %v723_v62 }
 0x120   :  { %v971_v34 = vmax.f32 %v878_v0, 0.0 }
 0x121   :  { %997 = vmatpush.msrb.mxu2 %v940_v60  ;;  %v2129_v61 = vadd.f32 %v807_v25, %v639_v28  ;;  %677 = vmatmul.bf16.gmra.mxu0 %v1242_v48  ;;  %v936_v25 = vmax.f32 %v790_v15, 0.0  ;;  %v2155_v28 = vadd.f32 %v892_v27, %v724_v50  ;;  %v894_v20 = vpop.f32.mrf.mxu2  ;;  %v711_v15 = vadd.f32 %v1832_v49, %v2060_v16 }
 0x122   :  { %v2158_v60 = vadd.f32 %v894_v20, %v726_v55  ;;  %v706_v16 = vadd.f32 %v1832_v49, %v2022_v52 }
 0x123   :  { %v809_v11 = vpop.f32.mrf.mxu1  ;;  %998 = vmatpush.msrb.mxu2 %v939_v4  ;;  %v716_v4 = vadd.f32 %v1832_v49, %v2094_v51  ;;  %v928_v51 = vmax.f32 %v1858_v2, 0.0  ;;  %v880_v47 = vadd.f32 %v2068_v22, %v711_v15  ;;  %v704_v2 = vadd.f32 %v1832_v49, %v2001_v40 }
 0x124   :  { %v875_v27 = vadd.f32 %v2032_v57, %v706_v16  ;;  %v699_v40 = vadd.f32 %v1832_v49, %v1959_v12  ;;  %v963_v15 = vmax.f32 %v1908_v36, 0.0 }
 0x125   :  { %999 = vmatpush.msrb.mxu2 %v938_v41  ;;  %v728_v41 = vpop.f32.mrf.mxu3  ;;  %v873_v7 = vadd.f32 %v2011_v45, %v704_v2 }
 0x126   :  { %v640_v13 = vpop.f32.mrf.mxu0  ;;  %v970_v46 = vmax.f32 %v875_v27, 0.0 }
 0x127   :  { %v641_v23 = vadd.f32 %v1832_v49, %v640_v13  ;;  %1000 = vmatpush.msrb.mxu2 %v937_v19  ;;  %v885_v19 = vadd.f32 %v2096_v56, %v716_v4  ;;  %v969_v50 = vmax.f32 %v873_v7, 0.0  ;;  %v965_v4 = vmax.f32 %v1946_v3, 0.0 }
 0x129   :  { %1001 = vmatpush.msrb.mxu2 %v936_v25  ;;  %v2140_v29 = vadd.f32 %v809_v11, %v641_v23  ;;  %v929_v11 = vmax.f32 %v1880_v14, 0.0  ;;  %v897_v13 = vpop.f32.mrf.mxu2  ;;  %v927_v14 = vmax.f32 %v1848_v58, 0.0  ;;  %v974_v23 = vmax.f32 %v885_v19, 0.0 }
 0x12a   :  { %v701_v58 = vadd.f32 %v1832_v49, %v1979_v26 }
 0x12b   :  { %v812_v32 = vpop.f32.mrf.mxu1  ;;  %1002 = vmatpush.msrb.mxu2 %v935_v37  ;;  %v972_v37 = vmax.f32 %v880_v47, 0.0 }
 0x12d   :  { %1003 = vmatpush.msrb.mxu2 %v934_v17  ;;  %v730_v25 = vpop.f32.mrf.mxu3 }
 0x12e   :  { %1436 = vmatmul.msk.bf16.gmra.mxu1 %vm488_vm1, %v1254_v33  ;;  %v643_v48 = vpop.f32.mrf.mxu0  ;;  %v729_v33 = vadd.f32 %v1832_v49, %v728_v41  ;;  %v731_v22 = vadd.f32 %v1832_v49, %v730_v25 }
 0x12f   :  { %v644_v59 = vadd.f32 %v1832_v49, %v643_v48  ;;  %1004 = vmatpush.msrb.mxu2 %v933_v44  ;;  %v870_v44 = vadd.f32 %v1988_v31, %v701_v58  ;;  %v868_v48 = vadd.f32 %v1968_v18, %v699_v40  ;;  %v966_v31 = vmax.f32 %v1948_v6, 0.0 }
 0x130   :  { %v2194_v43 = vadd.f32 %v897_v13, %v729_v33 }
 0x131   :  { %1005 = vmatpush.msrb.mxu2 %v932_v1  ;;  %v2160_v54 = vadd.f32 %v812_v32, %v644_v59  ;;  %682 = vmatmul.bf16.gmra.mxu0 %v1250_v35  ;;  %v899_v26 = vpop.f32.mrf.mxu2  ;;  %v968_v45 = vmax.f32 %v870_v44, 0.0  ;;  %v967_v1 = vmax.f32 %v868_v48, 0.0 }
 0x132   :  { %v2196_v57 = vadd.f32 %v899_v26, %v731_v22 }
 0x133   :  { %v814_v10 = vpop.f32.mrf.mxu1  ;;  %1006 = vmatpush.msrb.mxu2 %v931_v9 }
 0x135   :  { %1007 = vmatpush.msrb.mxu2 %v930_v5  ;;  %v733_v12 = vpop.f32.mrf.mxu3  ;;  %v964_v5 = vmax.f32 %v1910_v39, 0.0 }
 0x136   :  { %v645_v42 = vpop.f32.mrf.mxu0 }
 0x137   :  { %v646_v62 = vadd.f32 %v1832_v49, %v645_v42  ;;  %1008 = vmatpush.msrb.mxu2 %v929_v11  ;;  %v734_v11 = vadd.f32 %v1832_v49, %v733_v12 }
 0x139   :  { %1009 = vmatpush.msrb.mxu2 %v928_v51  ;;  %v2177_v21 = vadd.f32 %v814_v10, %v646_v62  ;;  %v902_v20 = vpop.f32.mrf.mxu2 }
 0x13a   :  { %v2212_v19 = vadd.f32 %v902_v20, %v734_v11 }
 0x13b   :  { %v817_v56 = vpop.f32.mrf.mxu1  ;;  %1010 = vmatpush.msrb.mxu2 %v927_v14 }
 0x13d   :  { %1035 = vmatpush.msra.mxu2 %v974_v23  ;;  %v735_v18 = vpop.f32.mrf.mxu3 }
 0x13e   :  { %v648_v52 = vpop.f32.mrf.mxu0  ;;  %v736_v41 = vadd.f32 %v1832_v49, %v735_v18 }
 0x13f   :  { %1036 = vmatpush.msra.mxu2 %v973_v38  ;;  %v649_v32 = vadd.f32 %v1832_v49, %v648_v52 }
 0x141   :  { %1037 = vmatpush.msra.mxu2 %v972_v37  ;;  %v2198_v17 = vadd.f32 %v817_v56, %v649_v32  ;;  %v904_v6 = vpop.f32.mrf.mxu2 }
 0x142   :  { %v2214_v62 = vadd.f32 %v904_v6, %v736_v41 }
 0x143   :  { %v819_v35 = vpop.f32.mrf.mxu1  ;;  %1038 = vmatpush.msra.mxu2 %v971_v34 }
 0x145   :  { %1039 = vmatpush.msra.mxu2 %v970_v46  ;;  %v738_v14 = vpop.f32.mrf.mxu3 }
 0x146   :  { %v650_v55 = vpop.f32.mrf.mxu0  ;;  %v739_v36 = vadd.f32 %v1832_v49, %v738_v14 }
 0x147   :  { %1040 = vmatpush.msra.mxu2 %v969_v50  ;;  %v651_v59 = vadd.f32 %v1832_v49, %v650_v55 }
 0x149   :  { %1041 = vmatpush.msra.mxu2 %v968_v45  ;;  %v2203_v9 = vadd.f32 %v819_v35, %v651_v59  ;;  %v907_v47 = vpop.f32.mrf.mxu2 }
 0x14a   :  { %v2223_v23 = vadd.f32 %v907_v47, %v739_v36 }
 0x14b   :  { %v822_v10 = vpop.f32.mrf.mxu1  ;;  %1042 = vmatpush.msra.mxu2 %v967_v1 }
 0x14d   :  { %1043 = vmatpush.msra.mxu2 %v966_v31  ;;  %v2225_v37 = vpop.f32.mrf.mxu3 }
 0x14e   :  { %v653_v53 = vpop.f32.mrf.mxu0 }
 0x14f   :  { %1044 = vmatpush.msra.mxu2 %v965_v4  ;;  %v654_v42 = vadd.f32 %v1832_v49, %v653_v53 }
 0x151   :  { %1045 = vmatpush.msra.mxu2 %v964_v5  ;;  %v2216_v3 = vadd.f32 %v822_v10, %v654_v42  ;;  %v2227_v33 = vpop.f32.mrf.mxu2 }
 0x153   :  { %v824_v51 = vpop.f32.mrf.mxu1  ;;  %1046 = vmatpush.msra.mxu2 %v963_v15 }
 0x155   :  { %v2229_v32 = vpop.f32.mrf.mxu3 }
 0x156   :  { %v655_v39 = vpop.f32.mrf.mxu0 }
 0x157   :  { %v656_v24 = vadd.f32 %v1832_v49, %v655_v39 }
 0x159   :  { %v2219_v30 = vadd.f32 %v824_v51, %v656_v24  ;;  %v2231_v7 = vpop.f32.mrf.mxu2 }
 0x15b   :  { %v827_v13 = vpop.f32.mrf.mxu1 }
 0x15d   :  { %v2233_v44 = vpop.f32.mrf.mxu3 }
 0x15e   :  { %v658_v16 = vpop.f32.mrf.mxu0 }
 0x15f   :  { %v659_v56 = vadd.f32 %v1832_v49, %v658_v16 }
 0x161   :  { %v828_v2 = vadd.f32 %v827_v13, %v659_v56  ;;  %v2235_v35 = vpop.f32.mrf.mxu2 }
 0x163   :  { %v829_v0 = vpop.f32.mrf.mxu1 }
 0x165   :  { %v2237_v50 = vpop.f32.mrf.mxu3 }
 0x166   :  { %v660_v38 = vpop.f32.mrf.mxu0 }
 0x167   :  { %v661_v39 = vadd.f32 %v1832_v49, %v660_v38 }
 0x169   :  { %v2240_v55 = vpop.f32.mrf.mxu2 }
 0x16b   :  { %v832_v58 = vpop.f32.mrf.mxu1 }
 0x16d   :  { %v750_v41 = vpop.f32.mrf.mxu3 }
 0x16e   :  { %v663_v25 = vpop.f32.mrf.mxu0 }
 0x16f   :  { %v664_v42 = vadd.f32 %v1832_v49, %v663_v25 }
 0x171   :  { %v919_v14 = vpop.f32.mrf.mxu2  ;;  %v833_v36 = vadd.f32 %v832_v58, %v664_v42  ;;  %v950_v58 = vmax.f32 %v2219_v30, 0.0  ;;  %v749_v42 = vadd.f32 %v1832_v49, %v2237_v50 }
 0x173   :  { %v834_v27 = vpop.f32.mrf.mxu1 }
 0x175   :  { %v753_v25 = vpop.f32.mrf.mxu3 }
 0x176   :  { %v665_v52 = vpop.f32.mrf.mxu0 }
 0x177   :  { %v666_v5 = vadd.f32 %v1832_v49, %v665_v52  ;;  %v830_v52 = vadd.f32 %v829_v0, %v661_v39  ;;  %v949_v0 = vmax.f32 %v2216_v3, 0.0  ;;  %v945_v3 = vmax.f32 %v2160_v54, 0.0 }
 0x178   :  { %v943_v54 = vmax.f32 %v2129_v61, 0.0  ;;  %v746_v39 = vadd.f32 %v1832_v49, %v2233_v44  ;;  %v918_v61 = vadd.f32 %v2240_v55, %v749_v42  ;;  %v741_v44 = vadd.f32 %v1832_v49, %v2225_v37 }
 0x179   :  { %v835_v13 = vadd.f32 %v834_v27, %v666_v5  ;;  %v922_v38 = vpop.f32.mrf.mxu2  ;;  %v991_v27 = vld [vmem:[%s2314_s3] sm:$0xff] }
 0x17a   :  { %1011 = vmatmul.f32.vlgmr.msrb.gmra.mxu2 %v991_v27  ;;  %v978_v27 = vmax.f32 %v2158_v60, 0.0  ;;  %v1076_v60 = vld [vmem:[%s2316_s4 + $0x8] sm:$0xff] }
 0x17b   :  { %v837_v22 = vpop.f32.mrf.mxu1  ;;  %v954_v47 = vmax.f32 %v835_v13, 0.0  ;;  %v992_v13 = vld [vmem:[%s2314_s3 + $0x8] sm:$0xff] }
 0x17e   :  { %v668_v40 = vpop.f32.mrf.mxu0 }
 0x17f   :  { %v669_v31 = vadd.f32 %v1832_v49, %v668_v40  ;;  %v953_v40 = vmax.f32 %v833_v36, 0.0 }
 0x181   :  { %v838_v6 = vadd.f32 %v837_v22, %v669_v31  ;;  %v952_v22 = vmax.f32 %v830_v52, 0.0  ;;  %v754_v31 = vadd.f32 %v1832_v49, %v753_v25 }
 0x183   :  { %v839_v34 = vpop.f32.mrf.mxu1  ;;  %v955_v16 = vmax.f32 %v838_v6, 0.0 }
 0x186   :  { %v670_v26 = vpop.f32.mrf.mxu0 }
 0x187   :  { %v671_v1 = vadd.f32 %v1832_v49, %v670_v26  ;;  %v951_v26 = vmax.f32 %v828_v2, 0.0  ;;  %v947_v2 = vmax.f32 %v2198_v17, 0.0  ;;  %v944_v17 = vmax.f32 %v2140_v29, 0.0 }
 0x189   :  { %v840_v11 = vadd.f32 %v839_v34, %v671_v1  ;;  %v946_v1 = vmax.f32 %v2177_v21, 0.0 }
 0x18b   :  { %v842_v46 = vpop.f32.mrf.mxu1  ;;  %v956_v24 = vmax.f32 %v840_v11, 0.0 }
 0x18e   :  { %v673_v48 = vpop.f32.mrf.mxu0 }
 0x18f   :  { %v674_v45 = vadd.f32 %v1832_v49, %v673_v48 }
 0x191   :  { %v843_v4 = vadd.f32 %v842_v46, %v674_v45  ;;  %v755_v45 = vpop.f32.mrf.mxu3 }
 0x193   :  { %v844_v12 = vpop.f32.mrf.mxu1  ;;  %v957_v15 = vmax.f32 %v843_v4, 0.0 }
 0x196   :  { %v675_v59 = vpop.f32.mrf.mxu0 }
 0x197   :  { %v676_v20 = vadd.f32 %v1832_v49, %v675_v59  ;;  %v756_v59 = vadd.f32 %v1832_v49, %v755_v45 }
 0x199   :  { %v845_v10 = vadd.f32 %v844_v12, %v676_v20  ;;  %v948_v12 = vmax.f32 %v2203_v9, 0.0  ;;  %v924_v20 = vpop.f32.mrf.mxu2 }
 0x19a   :  { %v925_v9 = vadd.f32 %v924_v20, %v756_v59 }
 0x19b   :  { %v2245_v18 = vpop.f32.mrf.mxu1  ;;  %v958_v53 = vmax.f32 %v845_v10, 0.0  ;;  %v751_v10 = vadd.f32 %v1832_v49, %v750_v41 }
 0x19c   :  { %v990_v29 = vmax.f32 %v925_v9, 0.0 }
 0x19d   :  { %1015 = vmatpush.msrb.mxu3 %v958_v53 }
 0x19e   :  { %v678_v51 = vpop.f32.mrf.mxu0 }
 0x19f   :  { %1016 = vmatpush.msrb.mxu3 %v957_v15  ;;  %v923_v15 = vadd.f32 %v922_v38, %v754_v31  ;;  %v679_v41 = vadd.f32 %v1832_v49, %v678_v51  ;;  %v980_v38 = vmax.f32 %v2196_v57, 0.0  ;;  %v994_v57 = vld [vmem:[%s2314_s3 + $0x18] sm:$0xff] }
 0x1a1   :  { %1017 = vmatpush.msrb.mxu3 %v956_v24  ;;  %v920_v24 = vadd.f32 %v919_v14, %v751_v10  ;;  %v989_v51 = vmax.f32 %v923_v15, 0.0  ;;  %v848_v52 = vadd.f32 %v2245_v18, %v679_v41  ;;  %v915_v14 = vadd.f32 %v2235_v35, %v746_v39  ;;  %v993_v18 = vld [vmem:[%s2314_s3 + $0x10] sm:$0xff] }
 0x1a2   :  { %v982_v35 = vmax.f32 %v2214_v62, 0.0  ;;  %v975_v62 = vmax.f32 %v2124_v63, 0.0 }
 0x1a3   :  { %v849_v56 = vpop.f32.mrf.mxu1  ;;  %1018 = vmatpush.msrb.mxu3 %v955_v16  ;;  %v959_v55 = vmax.f32 %v848_v52, 0.0 }
 0x1a5   :  { %1019 = vmatpush.msrb.mxu3 %v954_v47  ;;  %v744_v47 = vadd.f32 %v1832_v49, %v2229_v32  ;;  %v987_v32 = vmax.f32 %v918_v61, 0.0 }
 0x1a6   :  { %v680_v34 = vpop.f32.mrf.mxu0 }
 0x1a7   :  { %1020 = vmatpush.msrb.mxu3 %v953_v40  ;;  %v681_v53 = vadd.f32 %v1832_v49, %v680_v34  ;;  %v988_v40 = vmax.f32 %v920_v24, 0.0  ;;  %v913_v25 = vadd.f32 %v2231_v7, %v744_v47  ;;  %v910_v34 = vadd.f32 %v2227_v33, %v741_v44 }
 0x1a8   :  { %v983_v7 = vmax.f32 %v2223_v23, 0.0  ;;  %v979_v33 = vmax.f32 %v2194_v43, 0.0  ;;  %v976_v23 = vmax.f32 %v2127_v8, 0.0 }
 0x1a9   :  { %1021 = vmatpush.msrb.mxu3 %v952_v22  ;;  %v850_v16 = vadd.f32 %v849_v56, %v681_v53  ;;  %v986_v22 = vmax.f32 %v915_v14, 0.0  ;;  %v984_v37 = vmax.f32 %v910_v34, 0.0 }
 0x1ab   :  { %1022 = vmatpush.msrb.mxu3 %v951_v26  ;;  %v852_v46 = vpop.f32.mrf.mxu1  ;;  %v960_v56 = vmax.f32 %v850_v16, 0.0  ;;  %v981_v26 = vmax.f32 %v2212_v19, 0.0 }
 0x1ad   :  { %1023 = vmatpush.msrb.mxu3 %v950_v58  ;;  %v977_v58 = vmax.f32 %v2155_v28, 0.0  ;;  %v1075_v28 = vld [vmem:[%s2316_s4] sm:$0xff] }
 0x1ae   :  { %v683_v48 = vpop.f32.mrf.mxu0 }
 0x1af   :  { %1024 = vmatpush.msrb.mxu3 %v949_v0  ;;  %v684_v30 = vadd.f32 %v1832_v49, %v683_v48 }
 0x1b1   :  { %1025 = vmatpush.msrb.mxu3 %v948_v12  ;;  %v853_v11 = vadd.f32 %v852_v46, %v684_v30  ;;  %v1544_v12 = vld [vmem:[%s2315_s5] ss:$0 sm:$0xff] }
 0x1b3   :  { %1026 = vmatpush.msrb.mxu3 %v947_v2  ;;  %v854_v5 = vpop.f32.mrf.mxu1  ;;  %v961_v36 = vmax.f32 %v853_v11, 0.0 }
 0x1b5   :  { %1027 = vmatpush.msrb.mxu3 %v946_v1 }
 0x1b6   :  { %v685_v4 = vpop.f32.mrf.mxu0 }
 0x1b7   :  { %1028 = vmatpush.msrb.mxu3 %v945_v3  ;;  %v686_v21 = vadd.f32 %v1832_v49, %v685_v4  ;;  %v985_v49 = vmax.f32 %v913_v25, 0.0 }
 0x1b9   :  { %1029 = vmatpush.msrb.mxu3 %v944_v17  ;;  %v855_v6 = vadd.f32 %v854_v5, %v686_v21 }
 0x1bb   :  { %1030 = vmatpush.msrb.mxu3 %v943_v54  ;;  %v962_v50 = vmax.f32 %v855_v6, 0.0 }
 0x1bc   :  { %1031 = vmatmul.f32.vlgmr.msrb.gmra.mxu3 %v992_v13 }
 0x1bd   :  { %1055 = vmatpush.msra.mxu3 %v990_v29  ;;  %1047 = vmatpush.msra.mxu2 %v962_v50 }
 0x1bf   :  { %1056 = vmatpush.msra.mxu3 %v989_v51  ;;  %1048 = vmatpush.msra.mxu2 %v961_v36 }
 0x1c1   :  { %1057 = vmatpush.msra.mxu3 %v988_v40  ;;  %1049 = vmatpush.msra.mxu2 %v960_v56 }
 0x1c3   :  { %1058 = vmatpush.msra.mxu3 %v987_v32  ;;  %1050 = vmatpush.msra.mxu2 %v959_v55 }
 0x1c4   :  { %1051 = vmatmul.f32.vlgmr.msra.gmra.mxu2 %v993_v18 }
 0x1c5   :  { %1059 = vmatpush.msra.mxu3 %v986_v22  ;;  %1099 = vmatpush.msrb.mxu2 %v1076_v60 }
 0x1c7   :  { %1060 = vmatpush.msra.mxu3 %v985_v49  ;;  %1100 = vmatpush.msrb.mxu2 %v1075_v28 }
 0x1c9   :  { %1061 = vmatpush.msra.mxu3 %v984_v37 }
 0x1cb   :  { %1062 = vmatpush.msra.mxu3 %v983_v7 }
 0x1cd   :  { %1063 = vmatpush.msra.mxu3 %v982_v35 }
 0x1cf   :  { %1064 = vmatpush.msra.mxu3 %v981_v26 }
 0x1d1   :  { %1065 = vmatpush.msra.mxu3 %v980_v38 }
 0x1d3   :  { %1066 = vmatpush.msra.mxu3 %v979_v33 }
 0x1d5   :  { %1067 = vmatpush.msra.mxu3 %v978_v27 }
 0x1d7   :  { %1068 = vmatpush.msra.mxu3 %v977_v58 }
 0x1d9   :  { %1069 = vmatpush.msra.mxu3 %v976_v23 }
 0x1db   :  { %1070 = vmatpush.msra.mxu3 %v975_v62 }
 0x1dc   :  { %1071 = vmatmul.f32.vlgmr.msra.gmra.mxu3 %v994_v57 }
 0x1fd   :  { %v1012_v8 = vpop.f32.mrf.mxu2 }
 0x23f   :  { %v1032_v43 = vpop.f32.mrf.mxu3 }
 0x240   :  { %v1033_v63 = vadd.f32 %v1032_v43, %v1012_v8 }
 0x247   :  { %v1052_v19 = vpop.f32.mrf.mxu2 }
 0x248   :  { %v1053_v46 = vadd.f32 %v1052_v19, %v1033_v63 }
 0x25f   :  { %v1072_v0 = vpop.f32.mrf.mxu3 }
 0x260   :  { %v1073_v48 = vadd.f32 %v1072_v0, %v1053_v46 }
 0x262   :  { %1451 = vmatmul.msk.f32.vlgmr.msrb.gmra.mxu2 %vm1081_vm2, %v1073_v48 }
 0x2e5   :  { %v1102_v45 = vpop.f32.mrf.mxu2 }
 0x2e6   :  { %v1103_v2 = vadd.f32 %v1544_v12, %v1102_v45 }
 0x2e8   :  { %1106 = vst.msk [vmem:[%s2317_s6] sm:$0xff] %vm1105_vm3, %v1103_v2 }

</bundles_post_ra>
